<compile_context>
chip_gen: v7x
topology: tpu7x:2x2x1
jax: 0.10.0
libtpu: 0.0.40
codegen_flags: <defaults>
</compile_context>

<pallas_src>
import functools
import math

import jax
import jax.numpy as jnp
from jax.experimental import pallas as pl
from jax.experimental.pallas import tpu as pltpu

PP = 128  # lane-dense padded width for param_x / the kernel output


def _norm(x, alpha, bias, eps):
    """PyTorch NormLayer: alpha*(x-mean)/(std+eps)+bias, std unbiased (N-1)."""
    d = x.shape[-1]
    mu = jnp.mean(x, axis=-1, keepdims=True)
    diff = x - mu
    var = jnp.sum(diff * diff, axis=-1, keepdims=True) / (d - 1)
    return alpha * diff / (jnp.sqrt(var) + eps) + bias


def encoder_kernel(fx_ref, px_ref,
                   wqkv_ref, bqkv_ref, wo_ref, bo_ref,
                   a1_ref, c1_ref, a2_ref, c2_ref,
                   w1_ref, d1_ref, w2_ref, d2_ref,
                   wpf_ref, wpp_ref, dp_ref,
                   out_ref,
                   *, num_layers, num_heads, eps):
    """One grid step == one batch element; all layers run inside the kernel."""
    fx = fx_ref[...]                       # (S, F)
    px = px_ref[...]                       # (S, PP)  (only first P lanes meaningful)
    S, F = fx.shape
    hd = F // num_heads
    scale = 1.0 / math.sqrt(hd)

    # Static unroll over layers (L is small); weights stay resident in VMEM.
    for l in range(num_layers):
        # --- norm_1 ---
        xn = _norm(fx, a1_ref[l], c1_ref[l], eps)

        # --- fused Q/K/V projection: one (S,F)x(F,3F) matmul ---
        qkv = jnp.dot(xn, wqkv_ref[l],
                      preferred_element_type=jnp.float32) + bqkv_ref[l]
        q = qkv[:, :F]
        k = qkv[:, F:2 * F]
        v = qkv[:, 2 * F:]

        # --- multi-head self-attention (dropout = identity) ---
        heads = []
        for h in range(num_heads):         # static unroll; tiny 2-D dots
            lo = h * hd
            hi = lo + hd
            qh = q[:, lo:hi]
            kh = k[:, lo:hi]
            vh = v[:, lo:hi]
            s = jnp.einsum("qd,kd->qk", qh, kh,
                           preferred_element_type=jnp.float32) * scale
            s = s - jnp.max(s, axis=-1, keepdims=True)
            e = jnp.exp(s)
            p = e / jnp.sum(e, axis=-1, keepdims=True)      # exact softmax
            heads.append(jnp.dot(p, vh, preferred_element_type=jnp.float32))
        o = jnp.concatenate(heads, axis=-1)                 # (S, F)
        attn = jnp.dot(o, wo_ref[l],
                       preferred_element_type=jnp.float32) + bo_ref[l]

        # Residual on the *normalized* features -- matches the torch reference
        # (feature_x is reassigned to norm_1(feature_x) before the residual).
        x1 = xn + attn

        # --- feed-forward (ReLU; dropout = identity) ---
        x2n = _norm(x1, a2_ref[l], c2_ref[l], eps)
        h1 = jnp.maximum(
            jnp.dot(x2n, w1_ref[l],
                    preferred_element_type=jnp.float32) + d1_ref[l], 0.0)
        ff = jnp.dot(h1, w2_ref[l],
                     preferred_element_type=jnp.float32) + d2_ref[l]
        x2 = x1 + ff

        # --- param update, lane-dense form of cat([x2, px]) @ Wp + b ---
        px = (jnp.dot(x2, wpf_ref[l], preferred_element_type=jnp.float32)
              + jnp.dot(px, wpp_ref[l], preferred_element_type=jnp.float32)
              + dp_ref[l])
        fx = x2

    out_ref[...] = px                      # lane-dense (S, PP) store


def run_encoder_stack(feature_x, param_x, sp, num_heads, eps=1e-6):
    """Run all encoder layers in a single pallas_call; grid = batch only."""
    B, S, F = feature_x.shape
    P = param_x.shape[-1]
    L = sp["wqkv"].shape[0]
    d_ff = sp["w1"].shape[-1]
    H = num_heads
    hd = F // H

    fx = feature_x.astype(jnp.float32)
    px = jnp.pad(param_x.astype(jnp.float32),
                 ((0, 0), (0, 0), (0, PP - P)))              # lane-dense slab

    names = ["wqkv", "bqkv", "wo", "bo", "a1", "c1", "a2", "c2",
             "w1", "d1", "w2", "d2", "wpf", "wpp", "dp"]
    weights = [sp[n] for n in names]

    def resident_spec(a):
        zeros = (0,) * a.ndim
        return pl.BlockSpec(tuple(a.shape), lambda b, _z=zeros: _z)

    in_specs = ([pl.BlockSpec((None, S, F), lambda b: (b, 0, 0)),
                 pl.BlockSpec((None, S, PP), lambda b: (b, 0, 0))]
                + [resident_spec(a) for a in weights])
    out_specs = pl.BlockSpec((None, S, PP), lambda b: (b, 0, 0))
    out_shape = jax.ShapeDtypeStruct((B, S, PP), jnp.float32)

    flops_per_layer = (
        2 * S * F * 3 * F                 # fused QKV projection
        + 4 * H * S * S * hd              # scores + PV
        + 2 * S * F * F                   # output projection
        + 4 * S * F * d_ff                # feed-forward
        + 2 * S * (F * PP + PP * PP))     # param update (lane-padded)
    cost = pl.CostEstimate(
        flops=int(B * L * flops_per_layer),
        transcendentals=int(B * L * (H * S * S + 4 * S)),
        bytes_accessed=int(sum(a.size * a.dtype.itemsize for a in weights)
                           + fx.size * 4 + px.size * 4 + B * S * PP * 4))

    kernel = functools.partial(encoder_kernel, num_layers=L,
                               num_heads=num_heads, eps=eps)
    out = pl.pallas_call(
        kernel,
        out_shape=out_shape,
        grid=(B,),
        in_specs=in_specs,
        out_specs=out_specs,
        compiler_params=pltpu.CompilerParams(
            dimension_semantics=("parallel",)),   # lets v7x use both TCs
        cost_estimate=cost,
    )(fx, px, *weights)
    return out[:, :, :P]


def init_encoder_params(key, question_num, max_choices, encoder_num,
                        attention_heads, num_annotator, emb_dim, d_ff=512):
    F = emb_dim + max_choices
    P = max_choices
    keys = jax.random.split(key, 2 + encoder_num)

    # Positional_Encoder embeddings (kaiming-normal-like, deterministic).
    ann_emb = jax.random.normal(keys[0], (num_annotator + 1, emb_dim),
                                jnp.float32) * math.sqrt(2.0 / emb_dim)
    q_emb = jax.random.normal(keys[1], (question_num, emb_dim),
                              jnp.float32) * math.sqrt(2.0 / emb_dim)

    def linear(k, din, dout):
        # weights stored as (in, out) so the kernel uses x @ W + b directly.
        k1, k2 = jax.random.split(k)
        bound = 1.0 / math.sqrt(din)
        w = jax.random.uniform(k1, (din, dout), jnp.float32, -bound, bound)
        b = jax.random.uniform(k2, (1, dout), jnp.float32, -bound, bound)
        return w, b

    per_layer = []
    for i in range(encoder_num):
        lk = jax.random.split(keys[2 + i], 7)
        wq, bq = linear(lk[0], F, F)
        wk, bk = linear(lk[1], F, F)
        wv, bv = linear(lk[2], F, F)
        wo, bo = linear(lk[3], F, F)
        w1, d1 = linear(lk[4], F, d_ff)
        w2, d2 = linear(lk[5], d_ff, F)
        wp, dp = linear(lk[6], F + P, P)
        # Fused QKV weight / bias.
        wqkv = jnp.concatenate([wq, wk, wv], axis=1)          # (F, 3F)
        bqkv = jnp.concatenate([bq, bk, bv], axis=1)          # (1, 3F)
        # Lane-dense (128-wide) padded param-update weights.
        wpf_pad = jnp.zeros((F, PP), jnp.float32).at[:, :P].set(wp[:F])
        wpp_pad = jnp.zeros((PP, PP), jnp.float32).at[:P, :P].set(wp[F:])
        dp_pad = jnp.zeros((1, PP), jnp.float32).at[:, :P].set(dp)
        per_layer.append(dict(
            wqkv=wqkv, bqkv=bqkv, wo=wo, bo=bo,
            a1=jnp.ones((1, F), jnp.float32), c1=jnp.zeros((1, F), jnp.float32),
            a2=jnp.ones((1, F), jnp.float32), c2=jnp.zeros((1, F), jnp.float32),
            w1=w1, d1=d1, w2=w2, d2=d2,
            wpf=wpf_pad, wpp=wpp_pad, dp=dp_pad))
    # Stack every per-layer tensor along a leading layer axis.
    stacked = {k: jnp.stack([lp[k] for lp in per_layer]) for k in per_layer[0]}
    return dict(annotator_embedding=ann_emb, question_embedding=q_emb,
                layers=stacked)


def encoder_forward(params, x, annotators, questions, attention_heads,
                    num_annotator):
    # Positional_Encoder (plain-JAX glue: gathers + concat).
    q_emb = params["question_embedding"][questions]                 # (B,S,E)
    ann = jnp.where(annotators < 0, num_annotator, annotators)
    a_emb = params["annotator_embedding"][ann]                      # (B,S,E)
    feature_x = jnp.concatenate([q_emb + a_emb, x[:, :, 1:]], axis=-1)
    param_x = x[:, :, 1:]
    # Single fused pallas_call over all encoder layers.
    return run_encoder_stack(feature_x, param_x, params["layers"],
                             attention_heads)


if __name__ == "__main__":
    # Small shapes consistent with the module.
    question_num = 10
    max_choices = 4
    encoder_num = 2
    attention_heads = 4
    num_annotator = 6
    annotator_embedding_dim = 28     # feature_dim = 28 + 4 = 32
    B, S = 2, 8

    key = jax.random.PRNGKey(0)
    kp, kx, ka, kq = jax.random.split(key, 4)
    params = init_encoder_params(kp, question_num, max_choices, encoder_num,
                                 attention_heads, num_annotator,
                                 annotator_embedding_dim)

    x = jax.random.normal(kx, (B, S, 1 + max_choices), jnp.float32)
    annotators = jax.random.randint(ka, (B, S), -1, num_annotator)
    questions = jax.random.randint(kq, (B, S), 0, question_num)

    fwd = jax.jit(functools.partial(encoder_forward,
                                    attention_heads=attention_heads,
                                    num_annotator=num_annotator))
    out = fwd(params, x, annotators, questions)
    out = jax.block_until_ready(out)
    assert out.shape == (B, S, max_choices), out.shape
    assert bool(jnp.all(jnp.isfinite(out)))
    print("KERNEL_OK")
</pallas_src>

<mosaic_0001>
module attributes {stable_mosaic.version = 11 : i64} {
  func.func @encoder_kernel(%arg0: i32, %arg1: memref<1x8x32xf32, #tpu.memory_space<vmem>>, %arg2: memref<1x8x128xf32, #tpu.memory_space<vmem>>, %arg3: memref<2x32x96xf32, #tpu.memory_space<vmem>>, %arg4: memref<2x1x96xf32, #tpu.memory_space<vmem>>, %arg5: memref<2x32x32xf32, #tpu.memory_space<vmem>>, %arg6: memref<2x1x32xf32, #tpu.memory_space<vmem>>, %arg7: memref<2x1x32xf32, #tpu.memory_space<vmem>>, %arg8: memref<2x1x32xf32, #tpu.memory_space<vmem>>, %arg9: memref<2x1x32xf32, #tpu.memory_space<vmem>>, %arg10: memref<2x1x32xf32, #tpu.memory_space<vmem>>, %arg11: memref<2x32x512xf32, #tpu.memory_space<vmem>>, %arg12: memref<2x1x512xf32, #tpu.memory_space<vmem>>, %arg13: memref<2x512x32xf32, #tpu.memory_space<vmem>>, %arg14: memref<2x1x32xf32, #tpu.memory_space<vmem>>, %arg15: memref<2x32x128xf32, #tpu.memory_space<vmem>>, %arg16: memref<2x128x128xf32, #tpu.memory_space<vmem>>, %arg17: memref<2x1x128xf32, #tpu.memory_space<vmem>>, %arg18: memref<1x8x128xf32, #tpu.memory_space<vmem>>) attributes {dimension_semantics = [#tpu.dimension_semantics<parallel>], iteration_bounds = array<i64: 2>, scalar_prefetch = 0 : i64, scratch_operands = 0 : i64, tpu.core_type = #tpu.core_type<tc>, window_params = [{transform_indices = @transform_0, window_bounds = array<i64: 1, 8, 32>}, {transform_indices = @transform_1, window_bounds = array<i64: 1, 8, 128>}, {pipeline_mode = #tpu.pipeline_mode<synchronous>, transform_indices = @transform_2, window_bounds = array<i64: 2, 32, 96>}, {pipeline_mode = #tpu.pipeline_mode<synchronous>, transform_indices = @transform_3, window_bounds = array<i64: 2, 1, 96>}, {pipeline_mode = #tpu.pipeline_mode<synchronous>, transform_indices = @transform_4, window_bounds = array<i64: 2, 32, 32>}, {pipeline_mode = #tpu.pipeline_mode<synchronous>, transform_indices = @transform_5, window_bounds = array<i64: 2, 1, 32>}, {pipeline_mode = #tpu.pipeline_mode<synchronous>, transform_indices = @transform_6, window_bounds = array<i64: 2, 1, 32>}, {pipeline_mode = #tpu.pipeline_mode<synchronous>, transform_indices = @transform_7, window_bounds = array<i64: 2, 1, 32>}, {pipeline_mode = #tpu.pipeline_mode<synchronous>, transform_indices = @transform_8, window_bounds = array<i64: 2, 1, 32>}, {pipeline_mode = #tpu.pipeline_mode<synchronous>, transform_indices = @transform_9, window_bounds = array<i64: 2, 1, 32>}, {pipeline_mode = #tpu.pipeline_mode<synchronous>, transform_indices = @transform_10, window_bounds = array<i64: 2, 32, 512>}, {pipeline_mode = #tpu.pipeline_mode<synchronous>, transform_indices = @transform_11, window_bounds = array<i64: 2, 1, 512>}, {pipeline_mode = #tpu.pipeline_mode<synchronous>, transform_indices = @transform_12, window_bounds = array<i64: 2, 512, 32>}, {pipeline_mode = #tpu.pipeline_mode<synchronous>, transform_indices = @transform_13, window_bounds = array<i64: 2, 1, 32>}, {pipeline_mode = #tpu.pipeline_mode<synchronous>, transform_indices = @transform_14, window_bounds = array<i64: 2, 32, 128>}, {pipeline_mode = #tpu.pipeline_mode<synchronous>, transform_indices = @transform_15, window_bounds = array<i64: 2, 128, 128>}, {pipeline_mode = #tpu.pipeline_mode<synchronous>, transform_indices = @transform_16, window_bounds = array<i64: 2, 1, 128>}, {transform_indices = @transform_17, window_bounds = array<i64: 1, 8, 128>}]} {
    %c0 = arith.constant 0 : index
    %c0_0 = arith.constant 0 : index
    %c0_1 = arith.constant 0 : index
    %0 = vector.load %arg1[%c0, %c0_0, %c0_1] : memref<1x8x32xf32, #tpu.memory_space<vmem>>, vector<1x8x32xf32>
    %1 = vector.shape_cast %0 : vector<1x8x32xf32> to vector<8x32xf32>
    %c0_2 = arith.constant 0 : index
    %c0_3 = arith.constant 0 : index
    %c0_4 = arith.constant 0 : index
    %2 = vector.load %arg2[%c0_2, %c0_3, %c0_4] : memref<1x8x128xf32, #tpu.memory_space<vmem>>, vector<1x8x128xf32>
    %3 = vector.shape_cast %2 : vector<1x8x128xf32> to vector<8x128xf32>
    %c0_5 = arith.constant 0 : index
    %c0_6 = arith.constant 0 : index
    %c0_7 = arith.constant 0 : index
    %4 = vector.load %arg7[%c0_5, %c0_6, %c0_7] : memref<2x1x32xf32, #tpu.memory_space<vmem>>, vector<1x1x32xf32>
    %5 = vector.shape_cast %4 : vector<1x1x32xf32> to vector<1x32xf32>
    %c0_8 = arith.constant 0 : index
    %c0_9 = arith.constant 0 : index
    %c0_10 = arith.constant 0 : index
    %6 = vector.load %arg8[%c0_8, %c0_9, %c0_10] : memref<2x1x32xf32, #tpu.memory_space<vmem>>, vector<1x1x32xf32>
    %7 = vector.shape_cast %6 : vector<1x1x32xf32> to vector<1x32xf32>
    %cst = arith.constant dense<0.000000e+00> : vector<8xf32>
    %8 = vector.multi_reduction <add>, %1, %cst [1] : vector<8x32xf32> to vector<8xf32>
    %9 = vector.shape_cast %8 : vector<8xf32> to vector<8x1xf32>
    %cst_11 = arith.constant 3.200000e+01 : f32
    %10 = vector.broadcast %cst_11 : f32 to vector<8x1xf32>
    %11 = arith.divf %9, %10 : vector<8x1xf32>
    %12 = vector.broadcast %11 : vector<8x1xf32> to vector<8x32xf32>
    %13 = arith.subf %1, %12 : vector<8x32xf32>
    %14 = arith.mulf %13, %13 : vector<8x32xf32>
    %cst_12 = arith.constant dense<0.000000e+00> : vector<8xf32>
    %15 = vector.multi_reduction <add>, %14, %cst_12 [1] : vector<8x32xf32> to vector<8xf32>
    %16 = vector.shape_cast %15 : vector<8xf32> to vector<8x1xf32>
    %cst_13 = arith.constant 3.100000e+01 : f32
    %17 = vector.broadcast %cst_13 : f32 to vector<8x1xf32>
    %18 = arith.divf %16, %17 : vector<8x1xf32>
    %19 = vector.broadcast %5 : vector<1x32xf32> to vector<8x32xf32>
    %20 = arith.mulf %19, %13 : vector<8x32xf32>
    %21 = math.sqrt %18 : vector<8x1xf32>
    %cst_14 = arith.constant 9.99999997E-7 : f32
    %22 = vector.broadcast %cst_14 : f32 to vector<8x1xf32>
    %23 = arith.addf %21, %22 : vector<8x1xf32>
    %24 = vector.broadcast %23 : vector<8x1xf32> to vector<8x32xf32>
    %25 = arith.divf %20, %24 : vector<8x32xf32>
    %26 = vector.broadcast %7 : vector<1x32xf32> to vector<8x32xf32>
    %27 = arith.addf %25, %26 : vector<8x32xf32>
    %c0_15 = arith.constant 0 : index
    %c0_16 = arith.constant 0 : index
    %c0_17 = arith.constant 0 : index
    %28 = vector.load %arg3[%c0_15, %c0_16, %c0_17] : memref<2x32x96xf32, #tpu.memory_space<vmem>>, vector<1x32x96xf32>
    %29 = vector.shape_cast %28 : vector<1x32x96xf32> to vector<32x96xf32>
    %cst_18 = arith.constant dense<0.000000e+00> : vector<8x96xf32>
    %30 = tpu.matmul %27, %29, %cst_18 {dimension_numbers = #tpu.dot_dimension_numbers<[1], [0], [0], [1], [0, 0, 1, 1], [], []>} : vector<8x32xf32>, vector<32x96xf32>, vector<8x96xf32> -> vector<8x96xf32>
    %c0_19 = arith.constant 0 : index
    %c0_20 = arith.constant 0 : index
    %c0_21 = arith.constant 0 : index
    %31 = vector.load %arg4[%c0_19, %c0_20, %c0_21] : memref<2x1x96xf32, #tpu.memory_space<vmem>>, vector<1x1x96xf32>
    %32 = vector.shape_cast %31 : vector<1x1x96xf32> to vector<1x96xf32>
    %33 = vector.broadcast %32 : vector<1x96xf32> to vector<8x96xf32>
    %34 = arith.addf %30, %33 : vector<8x96xf32>
    %35 = vector.extract_strided_slice %34 {offsets = [0, 0], sizes = [8, 32], strides = [1, 1]} : vector<8x96xf32> to vector<8x32xf32>
    %36 = vector.extract_strided_slice %34 {offsets = [0, 32], sizes = [8, 32], strides = [1, 1]} : vector<8x96xf32> to vector<8x32xf32>
    %37 = vector.extract_strided_slice %34 {offsets = [0, 64], sizes = [8, 32], strides = [1, 1]} : vector<8x96xf32> to vector<8x32xf32>
    %38 = vector.extract_strided_slice %35 {offsets = [0, 0], sizes = [8, 8], strides = [1, 1]} : vector<8x32xf32> to vector<8x8xf32>
    %39 = vector.extract_strided_slice %36 {offsets = [0, 0], sizes = [8, 8], strides = [1, 1]} : vector<8x32xf32> to vector<8x8xf32>
    %40 = vector.extract_strided_slice %37 {offsets = [0, 0], sizes = [8, 8], strides = [1, 1]} : vector<8x32xf32> to vector<8x8xf32>
    "tpu.trace_start"() <{level = 10 : i32, message = "qd,kd->qk"}> : () -> ()
    %cst_22 = arith.constant dense<0.000000e+00> : vector<8x8xf32>
    %41 = tpu.matmul %38, %39, %cst_22 {dimension_numbers = #tpu.dot_dimension_numbers<[1], [1], [0], [0], [0, 0, 1, 0], [], []>} : vector<8x8xf32>, vector<8x8xf32>, vector<8x8xf32> -> vector<8x8xf32>
    "tpu.trace_stop"() : () -> ()
    %cst_23 = arith.constant 0.353553385 : f32
    %42 = vector.broadcast %cst_23 : f32 to vector<8x8xf32>
    %43 = arith.mulf %41, %42 : vector<8x8xf32>
    %cst_24 = arith.constant dense<0xFF800000> : vector<8xf32>
    %44 = vector.multi_reduction <maximumf>, %43, %cst_24 [1] : vector<8x8xf32> to vector<8xf32>
    %45 = vector.shape_cast %44 : vector<8xf32> to vector<8x1xf32>
    %46 = vector.broadcast %45 : vector<8x1xf32> to vector<8x8xf32>
    %47 = arith.subf %43, %46 : vector<8x8xf32>
    %48 = math.exp %47 : vector<8x8xf32>
    %cst_25 = arith.constant dense<0.000000e+00> : vector<8xf32>
    %49 = vector.multi_reduction <add>, %48, %cst_25 [1] : vector<8x8xf32> to vector<8xf32>
    %50 = vector.shape_cast %49 : vector<8xf32> to vector<8x1xf32>
    %51 = vector.broadcast %50 : vector<8x1xf32> to vector<8x8xf32>
    %52 = arith.divf %48, %51 : vector<8x8xf32>
    %cst_26 = arith.constant dense<0.000000e+00> : vector<8x8xf32>
    %53 = tpu.matmul %52, %40, %cst_26 {dimension_numbers = #tpu.dot_dimension_numbers<[1], [0], [0], [1], [0, 0, 1, 1], [], []>} : vector<8x8xf32>, vector<8x8xf32>, vector<8x8xf32> -> vector<8x8xf32>
    %54 = vector.extract_strided_slice %35 {offsets = [0, 8], sizes = [8, 8], strides = [1, 1]} : vector<8x32xf32> to vector<8x8xf32>
    %55 = vector.extract_strided_slice %36 {offsets = [0, 8], sizes = [8, 8], strides = [1, 1]} : vector<8x32xf32> to vector<8x8xf32>
    %56 = vector.extract_strided_slice %37 {offsets = [0, 8], sizes = [8, 8], strides = [1, 1]} : vector<8x32xf32> to vector<8x8xf32>
    "tpu.trace_start"() <{level = 10 : i32, message = "qd,kd->qk"}> : () -> ()
    %cst_27 = arith.constant dense<0.000000e+00> : vector<8x8xf32>
    %57 = tpu.matmul %54, %55, %cst_27 {dimension_numbers = #tpu.dot_dimension_numbers<[1], [1], [0], [0], [0, 0, 1, 0], [], []>} : vector<8x8xf32>, vector<8x8xf32>, vector<8x8xf32> -> vector<8x8xf32>
    "tpu.trace_stop"() : () -> ()
    %cst_28 = arith.constant 0.353553385 : f32
    %58 = vector.broadcast %cst_28 : f32 to vector<8x8xf32>
    %59 = arith.mulf %57, %58 : vector<8x8xf32>
    %cst_29 = arith.constant dense<0xFF800000> : vector<8xf32>
    %60 = vector.multi_reduction <maximumf>, %59, %cst_29 [1] : vector<8x8xf32> to vector<8xf32>
    %61 = vector.shape_cast %60 : vector<8xf32> to vector<8x1xf32>
    %62 = vector.broadcast %61 : vector<8x1xf32> to vector<8x8xf32>
    %63 = arith.subf %59, %62 : vector<8x8xf32>
    %64 = math.exp %63 : vector<8x8xf32>
    %cst_30 = arith.constant dense<0.000000e+00> : vector<8xf32>
    %65 = vector.multi_reduction <add>, %64, %cst_30 [1] : vector<8x8xf32> to vector<8xf32>
    %66 = vector.shape_cast %65 : vector<8xf32> to vector<8x1xf32>
    %67 = vector.broadcast %66 : vector<8x1xf32> to vector<8x8xf32>
    %68 = arith.divf %64, %67 : vector<8x8xf32>
    %cst_31 = arith.constant dense<0.000000e+00> : vector<8x8xf32>
    %69 = tpu.matmul %68, %56, %cst_31 {dimension_numbers = #tpu.dot_dimension_numbers<[1], [0], [0], [1], [0, 0, 1, 1], [], []>} : vector<8x8xf32>, vector<8x8xf32>, vector<8x8xf32> -> vector<8x8xf32>
    %70 = vector.extract_strided_slice %35 {offsets = [0, 16], sizes = [8, 8], strides = [1, 1]} : vector<8x32xf32> to vector<8x8xf32>
    %71 = vector.extract_strided_slice %36 {offsets = [0, 16], sizes = [8, 8], strides = [1, 1]} : vector<8x32xf32> to vector<8x8xf32>
    %72 = vector.extract_strided_slice %37 {offsets = [0, 16], sizes = [8, 8], strides = [1, 1]} : vector<8x32xf32> to vector<8x8xf32>
    "tpu.trace_start"() <{level = 10 : i32, message = "qd,kd->qk"}> : () -> ()
    %cst_32 = arith.constant dense<0.000000e+00> : vector<8x8xf32>
    %73 = tpu.matmul %70, %71, %cst_32 {dimension_numbers = #tpu.dot_dimension_numbers<[1], [1], [0], [0], [0, 0, 1, 0], [], []>} : vector<8x8xf32>, vector<8x8xf32>, vector<8x8xf32> -> vector<8x8xf32>
    "tpu.trace_stop"() : () -> ()
    %cst_33 = arith.constant 0.353553385 : f32
    %74 = vector.broadcast %cst_33 : f32 to vector<8x8xf32>
    %75 = arith.mulf %73, %74 : vector<8x8xf32>
    %cst_34 = arith.constant dense<0xFF800000> : vector<8xf32>
    %76 = vector.multi_reduction <maximumf>, %75, %cst_34 [1] : vector<8x8xf32> to vector<8xf32>
    %77 = vector.shape_cast %76 : vector<8xf32> to vector<8x1xf32>
    %78 = vector.broadcast %77 : vector<8x1xf32> to vector<8x8xf32>
    %79 = arith.subf %75, %78 : vector<8x8xf32>
    %80 = math.exp %79 : vector<8x8xf32>
    %cst_35 = arith.constant dense<0.000000e+00> : vector<8xf32>
    %81 = vector.multi_reduction <add>, %80, %cst_35 [1] : vector<8x8xf32> to vector<8xf32>
    %82 = vector.shape_cast %81 : vector<8xf32> to vector<8x1xf32>
    %83 = vector.broadcast %82 : vector<8x1xf32> to vector<8x8xf32>
    %84 = arith.divf %80, %83 : vector<8x8xf32>
    %cst_36 = arith.constant dense<0.000000e+00> : vector<8x8xf32>
    %85 = tpu.matmul %84, %72, %cst_36 {dimension_numbers = #tpu.dot_dimension_numbers<[1], [0], [0], [1], [0, 0, 1, 1], [], []>} : vector<8x8xf32>, vector<8x8xf32>, vector<8x8xf32> -> vector<8x8xf32>
    %86 = vector.extract_strided_slice %35 {offsets = [0, 24], sizes = [8, 8], strides = [1, 1]} : vector<8x32xf32> to vector<8x8xf32>
    %87 = vector.extract_strided_slice %36 {offsets = [0, 24], sizes = [8, 8], strides = [1, 1]} : vector<8x32xf32> to vector<8x8xf32>
    %88 = vector.extract_strided_slice %37 {offsets = [0, 24], sizes = [8, 8], strides = [1, 1]} : vector<8x32xf32> to vector<8x8xf32>
    "tpu.trace_start"() <{level = 10 : i32, message = "qd,kd->qk"}> : () -> ()
    %cst_37 = arith.constant dense<0.000000e+00> : vector<8x8xf32>
    %89 = tpu.matmul %86, %87, %cst_37 {dimension_numbers = #tpu.dot_dimension_numbers<[1], [1], [0], [0], [0, 0, 1, 0], [], []>} : vector<8x8xf32>, vector<8x8xf32>, vector<8x8xf32> -> vector<8x8xf32>
    "tpu.trace_stop"() : () -> ()
    %cst_38 = arith.constant 0.353553385 : f32
    %90 = vector.broadcast %cst_38 : f32 to vector<8x8xf32>
    %91 = arith.mulf %89, %90 : vector<8x8xf32>
    %cst_39 = arith.constant dense<0xFF800000> : vector<8xf32>
    %92 = vector.multi_reduction <maximumf>, %91, %cst_39 [1] : vector<8x8xf32> to vector<8xf32>
    %93 = vector.shape_cast %92 : vector<8xf32> to vector<8x1xf32>
    %94 = vector.broadcast %93 : vector<8x1xf32> to vector<8x8xf32>
    %95 = arith.subf %91, %94 : vector<8x8xf32>
    %96 = math.exp %95 : vector<8x8xf32>
    %cst_40 = arith.constant dense<0.000000e+00> : vector<8xf32>
    %97 = vector.multi_reduction <add>, %96, %cst_40 [1] : vector<8x8xf32> to vector<8xf32>
    %98 = vector.shape_cast %97 : vector<8xf32> to vector<8x1xf32>
    %99 = vector.broadcast %98 : vector<8x1xf32> to vector<8x8xf32>
    %100 = arith.divf %96, %99 : vector<8x8xf32>
    %cst_41 = arith.constant dense<0.000000e+00> : vector<8x8xf32>
    %101 = tpu.matmul %100, %88, %cst_41 {dimension_numbers = #tpu.dot_dimension_numbers<[1], [0], [0], [1], [0, 0, 1, 1], [], []>} : vector<8x8xf32>, vector<8x8xf32>, vector<8x8xf32> -> vector<8x8xf32>
    %102 = tpu.concatenate %53, %69, %85, %101 in 1 : vector<8x8xf32>, vector<8x8xf32>, vector<8x8xf32>, vector<8x8xf32> -> vector<8x32xf32>
    %c0_42 = arith.constant 0 : index
    %c0_43 = arith.constant 0 : index
    %c0_44 = arith.constant 0 : index
    %103 = vector.load %arg5[%c0_42, %c0_43, %c0_44] : memref<2x32x32xf32, #tpu.memory_space<vmem>>, vector<1x32x32xf32>
    %104 = vector.shape_cast %103 : vector<1x32x32xf32> to vector<32x32xf32>
    %cst_45 = arith.constant dense<0.000000e+00> : vector<8x32xf32>
    %105 = tpu.matmul %102, %104, %cst_45 {dimension_numbers = #tpu.dot_dimension_numbers<[1], [0], [0], [1], [0, 0, 1, 1], [], []>} : vector<8x32xf32>, vector<32x32xf32>, vector<8x32xf32> -> vector<8x32xf32>
    %c0_46 = arith.constant 0 : index
    %c0_47 = arith.constant 0 : index
    %c0_48 = arith.constant 0 : index
    %106 = vector.load %arg6[%c0_46, %c0_47, %c0_48] : memref<2x1x32xf32, #tpu.memory_space<vmem>>, vector<1x1x32xf32>
    %107 = vector.shape_cast %106 : vector<1x1x32xf32> to vector<1x32xf32>
    %108 = vector.broadcast %107 : vector<1x32xf32> to vector<8x32xf32>
    %109 = arith.addf %105, %108 : vector<8x32xf32>
    %110 = arith.addf %27, %109 : vector<8x32xf32>
    %c0_49 = arith.constant 0 : index
    %c0_50 = arith.constant 0 : index
    %c0_51 = arith.constant 0 : index
    %111 = vector.load %arg9[%c0_49, %c0_50, %c0_51] : memref<2x1x32xf32, #tpu.memory_space<vmem>>, vector<1x1x32xf32>
    %112 = vector.shape_cast %111 : vector<1x1x32xf32> to vector<1x32xf32>
    %c0_52 = arith.constant 0 : index
    %c0_53 = arith.constant 0 : index
    %c0_54 = arith.constant 0 : index
    %113 = vector.load %arg10[%c0_52, %c0_53, %c0_54] : memref<2x1x32xf32, #tpu.memory_space<vmem>>, vector<1x1x32xf32>
    %114 = vector.shape_cast %113 : vector<1x1x32xf32> to vector<1x32xf32>
    %cst_55 = arith.constant dense<0.000000e+00> : vector<8xf32>
    %115 = vector.multi_reduction <add>, %110, %cst_55 [1] : vector<8x32xf32> to vector<8xf32>
    %116 = vector.shape_cast %115 : vector<8xf32> to vector<8x1xf32>
    %cst_56 = arith.constant 3.200000e+01 : f32
    %117 = vector.broadcast %cst_56 : f32 to vector<8x1xf32>
    %118 = arith.divf %116, %117 : vector<8x1xf32>
    %119 = vector.broadcast %118 : vector<8x1xf32> to vector<8x32xf32>
    %120 = arith.subf %110, %119 : vector<8x32xf32>
    %121 = arith.mulf %120, %120 : vector<8x32xf32>
    %cst_57 = arith.constant dense<0.000000e+00> : vector<8xf32>
    %122 = vector.multi_reduction <add>, %121, %cst_57 [1] : vector<8x32xf32> to vector<8xf32>
    %123 = vector.shape_cast %122 : vector<8xf32> to vector<8x1xf32>
    %cst_58 = arith.constant 3.100000e+01 : f32
    %124 = vector.broadcast %cst_58 : f32 to vector<8x1xf32>
    %125 = arith.divf %123, %124 : vector<8x1xf32>
    %126 = vector.broadcast %112 : vector<1x32xf32> to vector<8x32xf32>
    %127 = arith.mulf %126, %120 : vector<8x32xf32>
    %128 = math.sqrt %125 : vector<8x1xf32>
    %cst_59 = arith.constant 9.99999997E-7 : f32
    %129 = vector.broadcast %cst_59 : f32 to vector<8x1xf32>
    %130 = arith.addf %128, %129 : vector<8x1xf32>
    %131 = vector.broadcast %130 : vector<8x1xf32> to vector<8x32xf32>
    %132 = arith.divf %127, %131 : vector<8x32xf32>
    %133 = vector.broadcast %114 : vector<1x32xf32> to vector<8x32xf32>
    %134 = arith.addf %132, %133 : vector<8x32xf32>
    %c0_60 = arith.constant 0 : index
    %c0_61 = arith.constant 0 : index
    %c0_62 = arith.constant 0 : index
    %135 = vector.load %arg11[%c0_60, %c0_61, %c0_62] : memref<2x32x512xf32, #tpu.memory_space<vmem>>, vector<1x32x512xf32>
    %136 = vector.shape_cast %135 : vector<1x32x512xf32> to vector<32x512xf32>
    %cst_63 = arith.constant dense<0.000000e+00> : vector<8x512xf32>
    %137 = tpu.matmul %134, %136, %cst_63 {dimension_numbers = #tpu.dot_dimension_numbers<[1], [0], [0], [1], [0, 0, 1, 1], [], []>} : vector<8x32xf32>, vector<32x512xf32>, vector<8x512xf32> -> vector<8x512xf32>
    %c0_64 = arith.constant 0 : index
    %c0_65 = arith.constant 0 : index
    %c0_66 = arith.constant 0 : index
    %138 = vector.load %arg12[%c0_64, %c0_65, %c0_66] : memref<2x1x512xf32, #tpu.memory_space<vmem>>, vector<1x1x512xf32>
    %139 = vector.shape_cast %138 : vector<1x1x512xf32> to vector<1x512xf32>
    %140 = vector.broadcast %139 : vector<1x512xf32> to vector<8x512xf32>
    %141 = arith.addf %137, %140 : vector<8x512xf32>
    %cst_67 = arith.constant 0.000000e+00 : f32
    %142 = vector.broadcast %cst_67 : f32 to vector<8x512xf32>
    %143 = arith.maximumf %141, %142 : vector<8x512xf32>
    %c0_68 = arith.constant 0 : index
    %c0_69 = arith.constant 0 : index
    %c0_70 = arith.constant 0 : index
    %144 = vector.load %arg13[%c0_68, %c0_69, %c0_70] : memref<2x512x32xf32, #tpu.memory_space<vmem>>, vector<1x512x32xf32>
    %145 = vector.shape_cast %144 : vector<1x512x32xf32> to vector<512x32xf32>
    %cst_71 = arith.constant dense<0.000000e+00> : vector<8x32xf32>
    %146 = tpu.matmul %143, %145, %cst_71 {dimension_numbers = #tpu.dot_dimension_numbers<[1], [0], [0], [1], [0, 0, 1, 1], [], []>} : vector<8x512xf32>, vector<512x32xf32>, vector<8x32xf32> -> vector<8x32xf32>
    %c0_72 = arith.constant 0 : index
    %c0_73 = arith.constant 0 : index
    %c0_74 = arith.constant 0 : index
    %147 = vector.load %arg14[%c0_72, %c0_73, %c0_74] : memref<2x1x32xf32, #tpu.memory_space<vmem>>, vector<1x1x32xf32>
    %148 = vector.shape_cast %147 : vector<1x1x32xf32> to vector<1x32xf32>
    %149 = vector.broadcast %148 : vector<1x32xf32> to vector<8x32xf32>
    %150 = arith.addf %146, %149 : vector<8x32xf32>
    %151 = arith.addf %110, %150 : vector<8x32xf32>
    %c0_75 = arith.constant 0 : index
    %c0_76 = arith.constant 0 : index
    %c0_77 = arith.constant 0 : index
    %152 = vector.load %arg15[%c0_75, %c0_76, %c0_77] : memref<2x32x128xf32, #tpu.memory_space<vmem>>, vector<1x32x128xf32>
    %153 = vector.shape_cast %152 : vector<1x32x128xf32> to vector<32x128xf32>
    %cst_78 = arith.constant dense<0.000000e+00> : vector<8x128xf32>
    %154 = tpu.matmul %151, %153, %cst_78 {dimension_numbers = #tpu.dot_dimension_numbers<[1], [0], [0], [1], [0, 0, 1, 1], [], []>} : vector<8x32xf32>, vector<32x128xf32>, vector<8x128xf32> -> vector<8x128xf32>
    %c0_79 = arith.constant 0 : index
    %c0_80 = arith.constant 0 : index
    %c0_81 = arith.constant 0 : index
    %155 = vector.load %arg16[%c0_79, %c0_80, %c0_81] : memref<2x128x128xf32, #tpu.memory_space<vmem>>, vector<1x128x128xf32>
    %156 = vector.shape_cast %155 : vector<1x128x128xf32> to vector<128x128xf32>
    %cst_82 = arith.constant dense<0.000000e+00> : vector<8x128xf32>
    %157 = tpu.matmul %3, %156, %cst_82 {dimension_numbers = #tpu.dot_dimension_numbers<[1], [0], [0], [1], [0, 0, 1, 1], [], []>} : vector<8x128xf32>, vector<128x128xf32>, vector<8x128xf32> -> vector<8x128xf32>
    %158 = arith.addf %154, %157 : vector<8x128xf32>
    %c0_83 = arith.constant 0 : index
    %c0_84 = arith.constant 0 : index
    %c0_85 = arith.constant 0 : index
    %159 = vector.load %arg17[%c0_83, %c0_84, %c0_85] : memref<2x1x128xf32, #tpu.memory_space<vmem>>, vector<1x1x128xf32>
    %160 = vector.shape_cast %159 : vector<1x1x128xf32> to vector<1x128xf32>
    %161 = vector.broadcast %160 : vector<1x128xf32> to vector<8x128xf32>
    %162 = arith.addf %158, %161 : vector<8x128xf32>
    %c1 = arith.constant 1 : index
    %c0_86 = arith.constant 0 : index
    %c0_87 = arith.constant 0 : index
    %163 = vector.load %arg7[%c1, %c0_86, %c0_87] : memref<2x1x32xf32, #tpu.memory_space<vmem>>, vector<1x1x32xf32>
    %164 = vector.shape_cast %163 : vector<1x1x32xf32> to vector<1x32xf32>
    %c1_88 = arith.constant 1 : index
    %c0_89 = arith.constant 0 : index
    %c0_90 = arith.constant 0 : index
    %165 = vector.load %arg8[%c1_88, %c0_89, %c0_90] : memref<2x1x32xf32, #tpu.memory_space<vmem>>, vector<1x1x32xf32>
    %166 = vector.shape_cast %165 : vector<1x1x32xf32> to vector<1x32xf32>
    %cst_91 = arith.constant dense<0.000000e+00> : vector<8xf32>
    %167 = vector.multi_reduction <add>, %151, %cst_91 [1] : vector<8x32xf32> to vector<8xf32>
    %168 = vector.shape_cast %167 : vector<8xf32> to vector<8x1xf32>
    %cst_92 = arith.constant 3.200000e+01 : f32
    %169 = vector.broadcast %cst_92 : f32 to vector<8x1xf32>
    %170 = arith.divf %168, %169 : vector<8x1xf32>
    %171 = vector.broadcast %170 : vector<8x1xf32> to vector<8x32xf32>
    %172 = arith.subf %151, %171 : vector<8x32xf32>
    %173 = arith.mulf %172, %172 : vector<8x32xf32>
    %cst_93 = arith.constant dense<0.000000e+00> : vector<8xf32>
    %174 = vector.multi_reduction <add>, %173, %cst_93 [1] : vector<8x32xf32> to vector<8xf32>
    %175 = vector.shape_cast %174 : vector<8xf32> to vector<8x1xf32>
    %cst_94 = arith.constant 3.100000e+01 : f32
    %176 = vector.broadcast %cst_94 : f32 to vector<8x1xf32>
    %177 = arith.divf %175, %176 : vector<8x1xf32>
    %178 = vector.broadcast %164 : vector<1x32xf32> to vector<8x32xf32>
    %179 = arith.mulf %178, %172 : vector<8x32xf32>
    %180 = math.sqrt %177 : vector<8x1xf32>
    %cst_95 = arith.constant 9.99999997E-7 : f32
    %181 = vector.broadcast %cst_95 : f32 to vector<8x1xf32>
    %182 = arith.addf %180, %181 : vector<8x1xf32>
    %183 = vector.broadcast %182 : vector<8x1xf32> to vector<8x32xf32>
    %184 = arith.divf %179, %183 : vector<8x32xf32>
    %185 = vector.broadcast %166 : vector<1x32xf32> to vector<8x32xf32>
    %186 = arith.addf %184, %185 : vector<8x32xf32>
    %c1_96 = arith.constant 1 : index
    %c0_97 = arith.constant 0 : index
    %c0_98 = arith.constant 0 : index
    %187 = vector.load %arg3[%c1_96, %c0_97, %c0_98] : memref<2x32x96xf32, #tpu.memory_space<vmem>>, vector<1x32x96xf32>
    %188 = vector.shape_cast %187 : vector<1x32x96xf32> to vector<32x96xf32>
    %cst_99 = arith.constant dense<0.000000e+00> : vector<8x96xf32>
    %189 = tpu.matmul %186, %188, %cst_99 {dimension_numbers = #tpu.dot_dimension_numbers<[1], [0], [0], [1], [0, 0, 1, 1], [], []>} : vector<8x32xf32>, vector<32x96xf32>, vector<8x96xf32> -> vector<8x96xf32>
    %c1_100 = arith.constant 1 : index
    %c0_101 = arith.constant 0 : index
    %c0_102 = arith.constant 0 : index
    %190 = vector.load %arg4[%c1_100, %c0_101, %c0_102] : memref<2x1x96xf32, #tpu.memory_space<vmem>>, vector<1x1x96xf32>
    %191 = vector.shape_cast %190 : vector<1x1x96xf32> to vector<1x96xf32>
    %192 = vector.broadcast %191 : vector<1x96xf32> to vector<8x96xf32>
    %193 = arith.addf %189, %192 : vector<8x96xf32>
    %194 = vector.extract_strided_slice %193 {offsets = [0, 0], sizes = [8, 32], strides = [1, 1]} : vector<8x96xf32> to vector<8x32xf32>
    %195 = vector.extract_strided_slice %193 {offsets = [0, 32], sizes = [8, 32], strides = [1, 1]} : vector<8x96xf32> to vector<8x32xf32>
    %196 = vector.extract_strided_slice %193 {offsets = [0, 64], sizes = [8, 32], strides = [1, 1]} : vector<8x96xf32> to vector<8x32xf32>
    %197 = vector.extract_strided_slice %194 {offsets = [0, 0], sizes = [8, 8], strides = [1, 1]} : vector<8x32xf32> to vector<8x8xf32>
    %198 = vector.extract_strided_slice %195 {offsets = [0, 0], sizes = [8, 8], strides = [1, 1]} : vector<8x32xf32> to vector<8x8xf32>
    %199 = vector.extract_strided_slice %196 {offsets = [0, 0], sizes = [8, 8], strides = [1, 1]} : vector<8x32xf32> to vector<8x8xf32>
    "tpu.trace_start"() <{level = 10 : i32, message = "qd,kd->qk"}> : () -> ()
    %cst_103 = arith.constant dense<0.000000e+00> : vector<8x8xf32>
    %200 = tpu.matmul %197, %198, %cst_103 {dimension_numbers = #tpu.dot_dimension_numbers<[1], [1], [0], [0], [0, 0, 1, 0], [], []>} : vector<8x8xf32>, vector<8x8xf32>, vector<8x8xf32> -> vector<8x8xf32>
    "tpu.trace_stop"() : () -> ()
    %cst_104 = arith.constant 0.353553385 : f32
    %201 = vector.broadcast %cst_104 : f32 to vector<8x8xf32>
    %202 = arith.mulf %200, %201 : vector<8x8xf32>
    %cst_105 = arith.constant dense<0xFF800000> : vector<8xf32>
    %203 = vector.multi_reduction <maximumf>, %202, %cst_105 [1] : vector<8x8xf32> to vector<8xf32>
    %204 = vector.shape_cast %203 : vector<8xf32> to vector<8x1xf32>
    %205 = vector.broadcast %204 : vector<8x1xf32> to vector<8x8xf32>
    %206 = arith.subf %202, %205 : vector<8x8xf32>
    %207 = math.exp %206 : vector<8x8xf32>
    %cst_106 = arith.constant dense<0.000000e+00> : vector<8xf32>
    %208 = vector.multi_reduction <add>, %207, %cst_106 [1] : vector<8x8xf32> to vector<8xf32>
    %209 = vector.shape_cast %208 : vector<8xf32> to vector<8x1xf32>
    %210 = vector.broadcast %209 : vector<8x1xf32> to vector<8x8xf32>
    %211 = arith.divf %207, %210 : vector<8x8xf32>
    %cst_107 = arith.constant dense<0.000000e+00> : vector<8x8xf32>
    %212 = tpu.matmul %211, %199, %cst_107 {dimension_numbers = #tpu.dot_dimension_numbers<[1], [0], [0], [1], [0, 0, 1, 1], [], []>} : vector<8x8xf32>, vector<8x8xf32>, vector<8x8xf32> -> vector<8x8xf32>
    %213 = vector.extract_strided_slice %194 {offsets = [0, 8], sizes = [8, 8], strides = [1, 1]} : vector<8x32xf32> to vector<8x8xf32>
    %214 = vector.extract_strided_slice %195 {offsets = [0, 8], sizes = [8, 8], strides = [1, 1]} : vector<8x32xf32> to vector<8x8xf32>
    %215 = vector.extract_strided_slice %196 {offsets = [0, 8], sizes = [8, 8], strides = [1, 1]} : vector<8x32xf32> to vector<8x8xf32>
    "tpu.trace_start"() <{level = 10 : i32, message = "qd,kd->qk"}> : () -> ()
    %cst_108 = arith.constant dense<0.000000e+00> : vector<8x8xf32>
    %216 = tpu.matmul %213, %214, %cst_108 {dimension_numbers = #tpu.dot_dimension_numbers<[1], [1], [0], [0], [0, 0, 1, 0], [], []>} : vector<8x8xf32>, vector<8x8xf32>, vector<8x8xf32> -> vector<8x8xf32>
    "tpu.trace_stop"() : () -> ()
    %cst_109 = arith.constant 0.353553385 : f32
    %217 = vector.broadcast %cst_109 : f32 to vector<8x8xf32>
    %218 = arith.mulf %216, %217 : vector<8x8xf32>
    %cst_110 = arith.constant dense<0xFF800000> : vector<8xf32>
    %219 = vector.multi_reduction <maximumf>, %218, %cst_110 [1] : vector<8x8xf32> to vector<8xf32>
    %220 = vector.shape_cast %219 : vector<8xf32> to vector<8x1xf32>
    %221 = vector.broadcast %220 : vector<8x1xf32> to vector<8x8xf32>
    %222 = arith.subf %218, %221 : vector<8x8xf32>
    %223 = math.exp %222 : vector<8x8xf32>
    %cst_111 = arith.constant dense<0.000000e+00> : vector<8xf32>
    %224 = vector.multi_reduction <add>, %223, %cst_111 [1] : vector<8x8xf32> to vector<8xf32>
    %225 = vector.shape_cast %224 : vector<8xf32> to vector<8x1xf32>
    %226 = vector.broadcast %225 : vector<8x1xf32> to vector<8x8xf32>
    %227 = arith.divf %223, %226 : vector<8x8xf32>
    %cst_112 = arith.constant dense<0.000000e+00> : vector<8x8xf32>
    %228 = tpu.matmul %227, %215, %cst_112 {dimension_numbers = #tpu.dot_dimension_numbers<[1], [0], [0], [1], [0, 0, 1, 1], [], []>} : vector<8x8xf32>, vector<8x8xf32>, vector<8x8xf32> -> vector<8x8xf32>
    %229 = vector.extract_strided_slice %194 {offsets = [0, 16], sizes = [8, 8], strides = [1, 1]} : vector<8x32xf32> to vector<8x8xf32>
    %230 = vector.extract_strided_slice %195 {offsets = [0, 16], sizes = [8, 8], strides = [1, 1]} : vector<8x32xf32> to vector<8x8xf32>
    %231 = vector.extract_strided_slice %196 {offsets = [0, 16], sizes = [8, 8], strides = [1, 1]} : vector<8x32xf32> to vector<8x8xf32>
    "tpu.trace_start"() <{level = 10 : i32, message = "qd,kd->qk"}> : () -> ()
    %cst_113 = arith.constant dense<0.000000e+00> : vector<8x8xf32>
    %232 = tpu.matmul %229, %230, %cst_113 {dimension_numbers = #tpu.dot_dimension_numbers<[1], [1], [0], [0], [0, 0, 1, 0], [], []>} : vector<8x8xf32>, vector<8x8xf32>, vector<8x8xf32> -> vector<8x8xf32>
    "tpu.trace_stop"() : () -> ()
    %cst_114 = arith.constant 0.353553385 : f32
    %233 = vector.broadcast %cst_114 : f32 to vector<8x8xf32>
    %234 = arith.mulf %232, %233 : vector<8x8xf32>
    %cst_115 = arith.constant dense<0xFF800000> : vector<8xf32>
    %235 = vector.multi_reduction <maximumf>, %234, %cst_115 [1] : vector<8x8xf32> to vector<8xf32>
    %236 = vector.shape_cast %235 : vector<8xf32> to vector<8x1xf32>
    %237 = vector.broadcast %236 : vector<8x1xf32> to vector<8x8xf32>
    %238 = arith.subf %234, %237 : vector<8x8xf32>
    %239 = math.exp %238 : vector<8x8xf32>
    %cst_116 = arith.constant dense<0.000000e+00> : vector<8xf32>
    %240 = vector.multi_reduction <add>, %239, %cst_116 [1] : vector<8x8xf32> to vector<8xf32>
    %241 = vector.shape_cast %240 : vector<8xf32> to vector<8x1xf32>
    %242 = vector.broadcast %241 : vector<8x1xf32> to vector<8x8xf32>
    %243 = arith.divf %239, %242 : vector<8x8xf32>
    %cst_117 = arith.constant dense<0.000000e+00> : vector<8x8xf32>
    %244 = tpu.matmul %243, %231, %cst_117 {dimension_numbers = #tpu.dot_dimension_numbers<[1], [0], [0], [1], [0, 0, 1, 1], [], []>} : vector<8x8xf32>, vector<8x8xf32>, vector<8x8xf32> -> vector<8x8xf32>
    %245 = vector.extract_strided_slice %194 {offsets = [0, 24], sizes = [8, 8], strides = [1, 1]} : vector<8x32xf32> to vector<8x8xf32>
    %246 = vector.extract_strided_slice %195 {offsets = [0, 24], sizes = [8, 8], strides = [1, 1]} : vector<8x32xf32> to vector<8x8xf32>
    %247 = vector.extract_strided_slice %196 {offsets = [0, 24], sizes = [8, 8], strides = [1, 1]} : vector<8x32xf32> to vector<8x8xf32>
    "tpu.trace_start"() <{level = 10 : i32, message = "qd,kd->qk"}> : () -> ()
    %cst_118 = arith.constant dense<0.000000e+00> : vector<8x8xf32>
    %248 = tpu.matmul %245, %246, %cst_118 {dimension_numbers = #tpu.dot_dimension_numbers<[1], [1], [0], [0], [0, 0, 1, 0], [], []>} : vector<8x8xf32>, vector<8x8xf32>, vector<8x8xf32> -> vector<8x8xf32>
    "tpu.trace_stop"() : () -> ()
    %cst_119 = arith.constant 0.353553385 : f32
    %249 = vector.broadcast %cst_119 : f32 to vector<8x8xf32>
    %250 = arith.mulf %248, %249 : vector<8x8xf32>
    %cst_120 = arith.constant dense<0xFF800000> : vector<8xf32>
    %251 = vector.multi_reduction <maximumf>, %250, %cst_120 [1] : vector<8x8xf32> to vector<8xf32>
    %252 = vector.shape_cast %251 : vector<8xf32> to vector<8x1xf32>
    %253 = vector.broadcast %252 : vector<8x1xf32> to vector<8x8xf32>
    %254 = arith.subf %250, %253 : vector<8x8xf32>
    %255 = math.exp %254 : vector<8x8xf32>
    %cst_121 = arith.constant dense<0.000000e+00> : vector<8xf32>
    %256 = vector.multi_reduction <add>, %255, %cst_121 [1] : vector<8x8xf32> to vector<8xf32>
    %257 = vector.shape_cast %256 : vector<8xf32> to vector<8x1xf32>
    %258 = vector.broadcast %257 : vector<8x1xf32> to vector<8x8xf32>
    %259 = arith.divf %255, %258 : vector<8x8xf32>
    %cst_122 = arith.constant dense<0.000000e+00> : vector<8x8xf32>
    %260 = tpu.matmul %259, %247, %cst_122 {dimension_numbers = #tpu.dot_dimension_numbers<[1], [0], [0], [1], [0, 0, 1, 1], [], []>} : vector<8x8xf32>, vector<8x8xf32>, vector<8x8xf32> -> vector<8x8xf32>
    %261 = tpu.concatenate %212, %228, %244, %260 in 1 : vector<8x8xf32>, vector<8x8xf32>, vector<8x8xf32>, vector<8x8xf32> -> vector<8x32xf32>
    %c1_123 = arith.constant 1 : index
    %c0_124 = arith.constant 0 : index
    %c0_125 = arith.constant 0 : index
    %262 = vector.load %arg5[%c1_123, %c0_124, %c0_125] : memref<2x32x32xf32, #tpu.memory_space<vmem>>, vector<1x32x32xf32>
    %263 = vector.shape_cast %262 : vector<1x32x32xf32> to vector<32x32xf32>
    %cst_126 = arith.constant dense<0.000000e+00> : vector<8x32xf32>
    %264 = tpu.matmul %261, %263, %cst_126 {dimension_numbers = #tpu.dot_dimension_numbers<[1], [0], [0], [1], [0, 0, 1, 1], [], []>} : vector<8x32xf32>, vector<32x32xf32>, vector<8x32xf32> -> vector<8x32xf32>
    %c1_127 = arith.constant 1 : index
    %c0_128 = arith.constant 0 : index
    %c0_129 = arith.constant 0 : index
    %265 = vector.load %arg6[%c1_127, %c0_128, %c0_129] : memref<2x1x32xf32, #tpu.memory_space<vmem>>, vector<1x1x32xf32>
    %266 = vector.shape_cast %265 : vector<1x1x32xf32> to vector<1x32xf32>
    %267 = vector.broadcast %266 : vector<1x32xf32> to vector<8x32xf32>
    %268 = arith.addf %264, %267 : vector<8x32xf32>
    %269 = arith.addf %186, %268 : vector<8x32xf32>
    %c1_130 = arith.constant 1 : index
    %c0_131 = arith.constant 0 : index
    %c0_132 = arith.constant 0 : index
    %270 = vector.load %arg9[%c1_130, %c0_131, %c0_132] : memref<2x1x32xf32, #tpu.memory_space<vmem>>, vector<1x1x32xf32>
    %271 = vector.shape_cast %270 : vector<1x1x32xf32> to vector<1x32xf32>
    %c1_133 = arith.constant 1 : index
    %c0_134 = arith.constant 0 : index
    %c0_135 = arith.constant 0 : index
    %272 = vector.load %arg10[%c1_133, %c0_134, %c0_135] : memref<2x1x32xf32, #tpu.memory_space<vmem>>, vector<1x1x32xf32>
    %273 = vector.shape_cast %272 : vector<1x1x32xf32> to vector<1x32xf32>
    %cst_136 = arith.constant dense<0.000000e+00> : vector<8xf32>
    %274 = vector.multi_reduction <add>, %269, %cst_136 [1] : vector<8x32xf32> to vector<8xf32>
    %275 = vector.shape_cast %274 : vector<8xf32> to vector<8x1xf32>
    %cst_137 = arith.constant 3.200000e+01 : f32
    %276 = vector.broadcast %cst_137 : f32 to vector<8x1xf32>
    %277 = arith.divf %275, %276 : vector<8x1xf32>
    %278 = vector.broadcast %277 : vector<8x1xf32> to vector<8x32xf32>
    %279 = arith.subf %269, %278 : vector<8x32xf32>
    %280 = arith.mulf %279, %279 : vector<8x32xf32>
    %cst_138 = arith.constant dense<0.000000e+00> : vector<8xf32>
    %281 = vector.multi_reduction <add>, %280, %cst_138 [1] : vector<8x32xf32> to vector<8xf32>
    %282 = vector.shape_cast %281 : vector<8xf32> to vector<8x1xf32>
    %cst_139 = arith.constant 3.100000e+01 : f32
    %283 = vector.broadcast %cst_139 : f32 to vector<8x1xf32>
    %284 = arith.divf %282, %283 : vector<8x1xf32>
    %285 = vector.broadcast %271 : vector<1x32xf32> to vector<8x32xf32>
    %286 = arith.mulf %285, %279 : vector<8x32xf32>
    %287 = math.sqrt %284 : vector<8x1xf32>
    %cst_140 = arith.constant 9.99999997E-7 : f32
    %288 = vector.broadcast %cst_140 : f32 to vector<8x1xf32>
    %289 = arith.addf %287, %288 : vector<8x1xf32>
    %290 = vector.broadcast %289 : vector<8x1xf32> to vector<8x32xf32>
    %291 = arith.divf %286, %290 : vector<8x32xf32>
    %292 = vector.broadcast %273 : vector<1x32xf32> to vector<8x32xf32>
    %293 = arith.addf %291, %292 : vector<8x32xf32>
    %c1_141 = arith.constant 1 : index
    %c0_142 = arith.constant 0 : index
    %c0_143 = arith.constant 0 : index
    %294 = vector.load %arg11[%c1_141, %c0_142, %c0_143] : memref<2x32x512xf32, #tpu.memory_space<vmem>>, vector<1x32x512xf32>
    %295 = vector.shape_cast %294 : vector<1x32x512xf32> to vector<32x512xf32>
    %cst_144 = arith.constant dense<0.000000e+00> : vector<8x512xf32>
    %296 = tpu.matmul %293, %295, %cst_144 {dimension_numbers = #tpu.dot_dimension_numbers<[1], [0], [0], [1], [0, 0, 1, 1], [], []>} : vector<8x32xf32>, vector<32x512xf32>, vector<8x512xf32> -> vector<8x512xf32>
    %c1_145 = arith.constant 1 : index
    %c0_146 = arith.constant 0 : index
    %c0_147 = arith.constant 0 : index
    %297 = vector.load %arg12[%c1_145, %c0_146, %c0_147] : memref<2x1x512xf32, #tpu.memory_space<vmem>>, vector<1x1x512xf32>
    %298 = vector.shape_cast %297 : vector<1x1x512xf32> to vector<1x512xf32>
    %299 = vector.broadcast %298 : vector<1x512xf32> to vector<8x512xf32>
    %300 = arith.addf %296, %299 : vector<8x512xf32>
    %cst_148 = arith.constant 0.000000e+00 : f32
    %301 = vector.broadcast %cst_148 : f32 to vector<8x512xf32>
    %302 = arith.maximumf %300, %301 : vector<8x512xf32>
    %c1_149 = arith.constant 1 : index
    %c0_150 = arith.constant 0 : index
    %c0_151 = arith.constant 0 : index
    %303 = vector.load %arg13[%c1_149, %c0_150, %c0_151] : memref<2x512x32xf32, #tpu.memory_space<vmem>>, vector<1x512x32xf32>
    %304 = vector.shape_cast %303 : vector<1x512x32xf32> to vector<512x32xf32>
    %cst_152 = arith.constant dense<0.000000e+00> : vector<8x32xf32>
    %305 = tpu.matmul %302, %304, %cst_152 {dimension_numbers = #tpu.dot_dimension_numbers<[1], [0], [0], [1], [0, 0, 1, 1], [], []>} : vector<8x512xf32>, vector<512x32xf32>, vector<8x32xf32> -> vector<8x32xf32>
    %c1_153 = arith.constant 1 : index
    %c0_154 = arith.constant 0 : index
    %c0_155 = arith.constant 0 : index
    %306 = vector.load %arg14[%c1_153, %c0_154, %c0_155] : memref<2x1x32xf32, #tpu.memory_space<vmem>>, vector<1x1x32xf32>
    %307 = vector.shape_cast %306 : vector<1x1x32xf32> to vector<1x32xf32>
    %308 = vector.broadcast %307 : vector<1x32xf32> to vector<8x32xf32>
    %309 = arith.addf %305, %308 : vector<8x32xf32>
    %310 = arith.addf %269, %309 : vector<8x32xf32>
    %c1_156 = arith.constant 1 : index
    %c0_157 = arith.constant 0 : index
    %c0_158 = arith.constant 0 : index
    %311 = vector.load %arg15[%c1_156, %c0_157, %c0_158] : memref<2x32x128xf32, #tpu.memory_space<vmem>>, vector<1x32x128xf32>
    %312 = vector.shape_cast %311 : vector<1x32x128xf32> to vector<32x128xf32>
    %cst_159 = arith.constant dense<0.000000e+00> : vector<8x128xf32>
    %313 = tpu.matmul %310, %312, %cst_159 {dimension_numbers = #tpu.dot_dimension_numbers<[1], [0], [0], [1], [0, 0, 1, 1], [], []>} : vector<8x32xf32>, vector<32x128xf32>, vector<8x128xf32> -> vector<8x128xf32>
    %c1_160 = arith.constant 1 : index
    %c0_161 = arith.constant 0 : index
    %c0_162 = arith.constant 0 : index
    %314 = vector.load %arg16[%c1_160, %c0_161, %c0_162] : memref<2x128x128xf32, #tpu.memory_space<vmem>>, vector<1x128x128xf32>
    %315 = vector.shape_cast %314 : vector<1x128x128xf32> to vector<128x128xf32>
    %cst_163 = arith.constant dense<0.000000e+00> : vector<8x128xf32>
    %316 = tpu.matmul %162, %315, %cst_163 {dimension_numbers = #tpu.dot_dimension_numbers<[1], [0], [0], [1], [0, 0, 1, 1], [], []>} : vector<8x128xf32>, vector<128x128xf32>, vector<8x128xf32> -> vector<8x128xf32>
    %317 = arith.addf %313, %316 : vector<8x128xf32>
    %c1_164 = arith.constant 1 : index
    %c0_165 = arith.constant 0 : index
    %c0_166 = arith.constant 0 : index
    %318 = vector.load %arg17[%c1_164, %c0_165, %c0_166] : memref<2x1x128xf32, #tpu.memory_space<vmem>>, vector<1x1x128xf32>
    %319 = vector.shape_cast %318 : vector<1x1x128xf32> to vector<1x128xf32>
    %320 = vector.broadcast %319 : vector<1x128xf32> to vector<8x128xf32>
    %321 = arith.addf %317, %320 : vector<8x128xf32>
    %c0_167 = arith.constant 0 : index
    %c0_168 = arith.constant 0 : index
    %c0_169 = arith.constant 0 : index
    %322 = vector.load %arg18[%c0_167, %c0_168, %c0_169] : memref<1x8x128xf32, #tpu.memory_space<vmem>>, vector<1x8x128xf32>
    %323 = vector.shape_cast %322 : vector<1x8x128xf32> to vector<8x128xf32>
    %324 = vector.shape_cast %321 : vector<8x128xf32> to vector<1x8x128xf32>
    tpu.vector_store %arg18[%c0_167, %c0_168, %c0_169], %324 {strides = array<i32>} : memref<1x8x128xf32, #tpu.memory_space<vmem>>, vector<1x8x128xf32>,
    return
  }
  func.func @transform_0(%arg0: i32) -> (i32, i32, i32) {
    %c0_i32 = arith.constant 0 : i32
    %c0_i32_0 = arith.constant 0 : i32
    %c0_i32_1 = arith.constant 0 : i32
    return %arg0, %c0_i32, %c0_i32_0 : i32, i32, i32
  }
  func.func @transform_1(%arg0: i32) -> (i32, i32, i32) {
    %c0_i32 = arith.constant 0 : i32
    %c0_i32_0 = arith.constant 0 : i32
    %c0_i32_1 = arith.constant 0 : i32
    return %arg0, %c0_i32, %c0_i32_0 : i32, i32, i32
  }
  func.func @transform_2(%arg0: i32) -> (i32, i32, i32) {
    %c0_i32 = arith.constant 0 : i32
    %c0_i32_0 = arith.constant 0 : i32
    %c0_i32_1 = arith.constant 0 : i32
    %c0_i32_2 = arith.constant 0 : i32
    return %c0_i32, %c0_i32_0, %c0_i32_1 : i32, i32, i32
  }
  func.func @transform_3(%arg0: i32) -> (i32, i32, i32) {
    %c0_i32 = arith.constant 0 : i32
    %c0_i32_0 = arith.constant 0 : i32
    %c0_i32_1 = arith.constant 0 : i32
    %c0_i32_2 = arith.constant 0 : i32
    return %c0_i32, %c0_i32_0, %c0_i32_1 : i32, i32, i32
  }
  func.func @transform_4(%arg0: i32) -> (i32, i32, i32) {
    %c0_i32 = arith.constant 0 : i32
    %c0_i32_0 = arith.constant 0 : i32
    %c0_i32_1 = arith.constant 0 : i32
    %c0_i32_2 = arith.constant 0 : i32
    return %c0_i32, %c0_i32_0, %c0_i32_1 : i32, i32, i32
  }
  func.func @transform_5(%arg0: i32) -> (i32, i32, i32) {
    %c0_i32 = arith.constant 0 : i32
    %c0_i32_0 = arith.constant 0 : i32
    %c0_i32_1 = arith.constant 0 : i32
    %c0_i32_2 = arith.constant 0 : i32
    return %c0_i32, %c0_i32_0, %c0_i32_1 : i32, i32, i32
  }
  func.func @transform_6(%arg0: i32) -> (i32, i32, i32) {
    %c0_i32 = arith.constant 0 : i32
    %c0_i32_0 = arith.constant 0 : i32
    %c0_i32_1 = arith.constant 0 : i32
    %c0_i32_2 = arith.constant 0 : i32
    return %c0_i32, %c0_i32_0, %c0_i32_1 : i32, i32, i32
  }
  func.func @transform_7(%arg0: i32) -> (i32, i32, i32) {
    %c0_i32 = arith.constant 0 : i32
    %c0_i32_0 = arith.constant 0 : i32
    %c0_i32_1 = arith.constant 0 : i32
    %c0_i32_2 = arith.constant 0 : i32
    return %c0_i32, %c0_i32_0, %c0_i32_1 : i32, i32, i32
  }
  func.func @transform_8(%arg0: i32) -> (i32, i32, i32) {
    %c0_i32 = arith.constant 0 : i32
    %c0_i32_0 = arith.constant 0 : i32
    %c0_i32_1 = arith.constant 0 : i32
    %c0_i32_2 = arith.constant 0 : i32
    return %c0_i32, %c0_i32_0, %c0_i32_1 : i32, i32, i32
  }
  func.func @transform_9(%arg0: i32) -> (i32, i32, i32) {
    %c0_i32 = arith.constant 0 : i32
    %c0_i32_0 = arith.constant 0 : i32
    %c0_i32_1 = arith.constant 0 : i32
    %c0_i32_2 = arith.constant 0 : i32
    return %c0_i32, %c0_i32_0, %c0_i32_1 : i32, i32, i32
  }
  func.func @transform_10(%arg0: i32) -> (i32, i32, i32) {
    %c0_i32 = arith.constant 0 : i32
    %c0_i32_0 = arith.constant 0 : i32
    %c0_i32_1 = arith.constant 0 : i32
    %c0_i32_2 = arith.constant 0 : i32
    return %c0_i32, %c0_i32_0, %c0_i32_1 : i32, i32, i32
  }
  func.func @transform_11(%arg0: i32) -> (i32, i32, i32) {
    %c0_i32 = arith.constant 0 : i32
    %c0_i32_0 = arith.constant 0 : i32
    %c0_i32_1 = arith.constant 0 : i32
    %c0_i32_2 = arith.constant 0 : i32
    return %c0_i32, %c0_i32_0, %c0_i32_1 : i32, i32, i32
  }
  func.func @transform_12(%arg0: i32) -> (i32, i32, i32) {
    %c0_i32 = arith.constant 0 : i32
    %c0_i32_0 = arith.constant 0 : i32
    %c0_i32_1 = arith.constant 0 : i32
    %c0_i32_2 = arith.constant 0 : i32
    return %c0_i32, %c0_i32_0, %c0_i32_1 : i32, i32, i32
  }
  func.func @transform_13(%arg0: i32) -> (i32, i32, i32) {
    %c0_i32 = arith.constant 0 : i32
    %c0_i32_0 = arith.constant 0 : i32
    %c0_i32_1 = arith.constant 0 : i32
    %c0_i32_2 = arith.constant 0 : i32
    return %c0_i32, %c0_i32_0, %c0_i32_1 : i32, i32, i32
  }
  func.func @transform_14(%arg0: i32) -> (i32, i32, i32) {
    %c0_i32 = arith.constant 0 : i32
    %c0_i32_0 = arith.constant 0 : i32
    %c0_i32_1 = arith.constant 0 : i32
    %c0_i32_2 = arith.constant 0 : i32
    return %c0_i32, %c0_i32_0, %c0_i32_1 : i32, i32, i32
  }
  func.func @transform_15(%arg0: i32) -> (i32, i32, i32) {
    %c0_i32 = arith.constant 0 : i32
    %c0_i32_0 = arith.constant 0 : i32
    %c0_i32_1 = arith.constant 0 : i32
    %c0_i32_2 = arith.constant 0 : i32
    return %c0_i32, %c0_i32_0, %c0_i32_1 : i32, i32, i32
  }
  func.func @transform_16(%arg0: i32) -> (i32, i32, i32) {
    %c0_i32 = arith.constant 0 : i32
    %c0_i32_0 = arith.constant 0 : i32
    %c0_i32_1 = arith.constant 0 : i32
    %c0_i32_2 = arith.constant 0 : i32
    return %c0_i32, %c0_i32_0, %c0_i32_1 : i32, i32, i32
  }
  func.func @transform_17(%arg0: i32) -> (i32, i32, i32) {
    %c0_i32 = arith.constant 0 : i32
    %c0_i32_0 = arith.constant 0 : i32
    %c0_i32_1 = arith.constant 0 : i32
    return %arg0, %c0_i32, %c0_i32_0 : i32, i32, i32
  }
}

</mosaic_0001>

<bundles_post_ra>
// kernel: encoder_forward.1
= control target key start
LH: loop header
LB: loop body
LE: loop exit
PB: predicated region body
PF: predicated region fallthrough
CT: control target
= control target key end

     0   :  { %s4689_s24 = smov 0   ;;  %s5683_s0 = inlined_call_operand.vmem [shape: f32[2,8,32], index: 0, kind: input, shape index: {}]   ;;  %s5684_s1 = inlined_call_operand.vmem [shape: f32[2,8,128], index: 1, kind: input, shape index: {}]   ;;  %s5685_s2 = inlined_call_operand.vmem [shape: f32[2,32,96], index: 2, kind: input, shape index: {}]   ;;  %s5686_s3 = inlined_call_operand.vmem [shape: f32[2,1,96], index: 3, kind: input, shape index: {}]   ;;  %s5687_s4 = inlined_call_operand.vmem [shape: f32[2,32,32], index: 4, kind: input, shape index: {}]   ;;  %s5688_s5 = inlined_call_operand.vmem [shape: f32[2,1,32], index: 5, kind: input, shape index: {}]   ;;  %s5689_s6 = inlined_call_operand.vmem [shape: f32[2,1,32], index: 6, kind: input, shape index: {}]   ;;  %s5690_s7 = inlined_call_operand.vmem [shape: f32[2,1,32], index: 7, kind: input, shape index: {}]   ;;  %s5691_s8 = inlined_call_operand.vmem [shape: f32[2,1,32], index: 8, kind: input, shape index: {}]   ;;  %s5692_s9 = inlined_call_operand.vmem [shape: f32[2,1,32], index: 9, kind: input, shape index: {}]   ;;  %s5693_s10 = inlined_call_operand.vmem [shape: f32[2,32,512], index: 10, kind: input, shape index: {}]   ;;  %s5694_s11 = inlined_call_operand.vmem [shape: f32[2,1,512], index: 11, kind: input, shape index: {}]   ;;  %s5695_s12 = inlined_call_operand.vmem [shape: f32[2,512,32], index: 12, kind: input, shape index: {}]   ;;  %s5696_s13 = inlined_call_operand.vmem [shape: f32[2,1,32], index: 13, kind: input, shape index: {}]   ;;  %s5697_s14 = inlined_call_operand.vmem [shape: f32[2,32,128], index: 14, kind: input, shape index: {}]   ;;  %s5698_s15 = inlined_call_operand.vmem [shape: f32[2,128,128], index: 15, kind: input, shape index: {}]   ;;  %s5699_s16 = inlined_call_operand.vmem [shape: f32[2,1,128], index: 16, kind: input, shape index: {}]   ;;  %s5700_s17 = inlined_call_operand.vmem [shape: f32[2,8,128], index: 17, kind: output, shape index: {}]  }
   0x1   :  { %5713 = sst [smem:[#allocation2_spill]] %s5683_s0 }
   0x2   :  { %5714 = sst [smem:[#allocation3_spill]] %s5684_s1 }
   0x3 LB: > { %s3628_s25 = sadd.s32 4294967295, %s4580_s24   ;;  %p3632_p0 = scmp.ge.s32.totalorder %s4580_s24, 1  ;;  %s4580_s24 = sphi %s4689_s24, %s27_s24  }
   0x4   : > { %p495_p1 = scmp.lt.s32.totalorder %s4580_s24, 3 }
   0x6   : > { %p496_p2 = pnand %p3632_p0, %p495_p1 }
   0x7   : > { %p549_p3 = scmp.lt.s32.totalorder (!%p496_p2), %s3628_s25, 1  ;;  %vm565_vm0 = vcmask (!%p496_p2), 261120   ;;  %s5715_s29 = sld [smem:[#allocation2_spill]] (!%p496_p2)  ;;  %v602_v7 = vld [vmem:[%s5685_s2] sm:$0xff] (!%p496_p2)  ;;  %v603_v8 = vld [vmem:[%s5685_s2 + $0x8] sm:$0xff] (!%p496_p2)  ;;  %v604_v9 = vld [vmem:[%s5685_s2 + $0x10] sm:$0xff] (!%p496_p2) }
   0x8   : > { %499 = sbr.rel (%p496_p2) target bundleno = 5834 (0x16ca), region = 88  ;;  %v4582_v10 = vmov (!%p496_p2), 0.0|0.0   ;;  %v4258_v11 = vpack.c.bf16 (!%p496_p2), %v603_v8, %v602_v7  ;;  %v605_v12 = vld [vmem:[%s5685_s2 + $0x18] sm:$0xff] (!%p496_p2)  ;;  %vm4583_vm1 = vmmov (!%p496_p2), 0   ;;  %v4584_v13 = vmov (!%p496_p2), 0.0   ;;  %s5712_s18 = smov (!%p496_p2), 120  }
   0x9   : > { %4257 = vmatprep.subr.bf16.mxu0 (!%p496_p2), %v4582_v10  ;;  %4049 = vmatprep.mubr.msk.f32.mxu0 (!%p496_p2), %vm4583_vm1, %v4584_v13  ;;  %v4261_v14 = vpack.c.bf16 (!%p496_p2), %v605_v12, %v604_v9  ;;  %v3636_v23 = vld [vmem:[%s5689_s6] ss:$0 sm:$0xff] (!%p496_p2)  ;;  %s4586_s19 = smov (!%p496_p2), 96   ;;  %s4587_s1 = smov (!%p496_p2), 88   ;;  %vm689_vm4 = vcmask (!%p496_p2), 64512   ;;  %vm1363_vm5 = vcmask (!%p496_p2), 130048  }
   0xa   : > { %4052 = vmatprep.subr.mxu1 (!%p496_p2), %v4584_v13  ;;  %4054 = vmatprep.mubr.msk.f32.mxu1 (!%p496_p2), %vm4583_vm1, %v4584_v13  ;;  %v3637_v26 = vld [vmem:[%s5690_s7] ss:$0 sm:$0xff] (!%p496_p2)  ;;  %s5705_s20 = smov (!%p496_p2), 80   ;;  %s5711_s21 = smov (!%p496_p2), 112   ;;  %vm1365_vm6 = vcmask (!%p496_p2), 195584  }
   0xb   : > { %4259 = vmatpush3.bf16.msra.mxu0 (!%p496_p2), %v4258_v11  ;;  %v3638_v29 = vld [vmem:[%s5686_s3] ss:$0 sm:$0xff] (!%p496_p2)  ;;  %s5704_s22 = smov (!%p496_p2), 72   ;;  %s5710_s23 = smov (!%p496_p2), 104  }
   0xc   : > { %4260 = vmatprep.subr.bf16.mxu0 (!%p496_p2), %v4582_v10  ;;  %s5703_s27 = smov (!%p496_p2), 48   ;;  %s5701_s28 = smov (!%p496_p2), 40  }
   0xf   : > { %s5730_s25 = smov (!%p549_p3, %s3628_s25), 1  ;;  %4262 = vmatpush3.bf16.msra.mxu0 %v4261_v14 }
  0x10   : > { %s4697_s26 = sshll.u32 %s5730_s25, 3  ;;  %4062 = vmatprep.subr.mxu0 %v4584_v13  ;;  %s5706_s25 = smov 64  }
  0x11   : > { %s552_s0 = scalar_lea.vmem %s5715_s29, %s4697_s26  ;;  %s5702_s29 = smov 56  }
  0x12   : > { %v561_v0 = vld [vmem:[%s552_s0] sm:$0xff]  ;;  %s5709_s0 = smov 8  }
  0x13   : > { %v566_v1 = vsel %vm565_vm0, %v561_v0, 0.0 }
  0x14   : > { %567 = vadd.xlane.f32.xlu0 %v566_v1 }
  0xa1   : > { %v568_v2 = vpop.xlane.xlu0 %567 }
  0xa2   : > { %v570_v3 = vmul.f32 0.03125, %v568_v2 }
  0xa4   : > { %v571_v4 = vsub.f32 %v561_v0, %v570_v3 }
  0xa6   : > { %v572_v5 = vmul.f32 %v571_v4, %v571_v4  ;;  %v584_v24 = vmul.f32 %v3636_v23, %v571_v4 }
  0xa8   : > { %v573_v6 = vsel %vm565_vm0, %v572_v5, 0.0 }
  0xa9   : > { %574 = vadd.xlane.f32.xlu0 %v573_v6 }
 0x136   : > { %v575_v15 = vpop.xlane.xlu0 %574 }
 0x137   : > { %v577_v16 = vmul.f32 0.032258064, %v575_v15 }
 0x139   : > { %4526 = vrsqrt.f32 %v577_v16  ;;  %vm587_vm2 = vcmp.eq.f32.partialorder %v577_v16, inf  ;;  %v590_v19 = vand.u32 2147483648, %v577_v16  ;;  %vm589_vm3 = vcmp.eq.f32.partialorder %v577_v16, 0.0 }
 0x143   : > { %v4527_v17 = vpop.eup %4526 }
 0x144   : > { %v586_v18 = vmul.f32 %v4527_v17, %v577_v16 }
 0x146   : > { %v588_v20 = vsel %vm587_vm2, %v577_v16, %v586_v18 }
 0x147   : > { %v591_v21 = vsel %vm589_vm3, %v590_v19, %v588_v20 }
 0x148   : > { %v592_v22 = vadd.f32 1e-06, %v591_v21 }
 0x14a   : > { %4528 = vrcp.f32 %v592_v22 }
 0x154   : > { %v4529_v25 = vpop.eup %4528 }
 0x155   : > { %v594_v27 = vmul.f32 %v4529_v25, %v584_v24 }
 0x157   : > { %v4731_v28 = vadd.f32 %v3637_v26, %v594_v27 }
 0x159   : > { %4050 = vmatmul.mubr.msk.f32.vlgmr.msra.gmra.mrb[0].mxu0 %vm565_vm0, %v4731_v28 }
 0x15a   : > { %4064 = vmatprep.mubr.msk.f32.mxu0 %vm4583_vm1, %v4584_v13 }
 0x22c   : > { %v682_v30 = vpop.f32.mrb[0].mxu0 }
 0x22d   : > { %v4740_v31 = vadd.f32 %v3638_v29, %v682_v30  ;;  %v4051_v32 = vpop.f32.mrb[1].mxu0 }
 0x22e   : > { %v1368_v32 = vld [vmem:[%s5687_s4 + $0x8] sm:$0xff] }
 0x22f   : > { %852 = vrot.lane.b32.xlu0 %v4740_v31, %s5712_s18  ;;  %687 = vrot.lane.b32.xlu1 %v4740_v31, %s4586_s19  ;;  %s5722_s18 = smov 72  }
 0x233   : > { %854 = vrot.lane.b32.xlu1 %v4740_v31, %s4587_s1 }
 0x237   : > { %1020 = vrot.lane.b32.xlu1 %v4740_v31, %s5705_s20 }
 0x23b   : > { %1018 = vrot.lane.b32.xlu1 %v4740_v31, %s5711_s21  ;;  %s5718_s21 = smov 112  }
 0x23f   : > { %1186 = vrot.lane.b32.xlu1 %v4740_v31, %s5704_s22  ;;  %s5716_s22 = sld [smem:[#allocation3_spill]] }
 0x243   : > { %1184 = vrot.lane.b32.xlu1 %v4740_v31, %s5710_s23  ;;  %s5719_s23 = smov 104  }
 0x2a1   : > { %v688_v33 = vpop.permute.xlu1 %687  ;;  %v853_v35 = vpop.permute.xlu0 %852 }
 0x2a2   : > { %4053 = vmatpush3.xpose.msk.msra.mxu1 %vm689_vm4, %v688_v33 }
 0x2a3   : > { %4057 = vmatprep.subr.mxu1 %v4584_v13 }
 0x2a5   : > { %4055 = vmatmul.mubr.msk.f32.vlgmr.msra.gmra.mrb[0].mxu1 %vm689_vm4, %v4740_v31  ;;  %v855_v34 = vpop.permute.xlu1 %854 }
 0x2a6   : > { %4063 = vmatpush3.xpose.msk.msra.mxu0 %vm689_vm4, %v855_v34  ;;  %4059 = vmatprep.mubr.msk.f32.mxu1 %vm4583_vm1, %v4584_v13 }
 0x2a7   : > { %4072 = vmatprep.subr.mxu0 %v4584_v13 }
 0x2a9   : > { %4065 = vmatmul.mubr.msk.f32.vlgmr.msra.gmra.mrb[2].mxu0 %vm689_vm4, %v853_v35  ;;  %v1021_v36 = vpop.permute.xlu1 %1020 }
 0x2aa   : > { %4073 = vmatpush3.xpose.msk.msra.mxu0 %vm689_vm4, %v1021_v36  ;;  %4074 = vmatprep.mubr.msk.f32.mxu0 %vm4583_vm1, %v4584_v13  ;;  %v1369_v36 = vld [vmem:[%s5687_s4 + $0x10] sm:$0xff] }
 0x2ab   : > { %4082 = vmatprep.subr.mxu0 %v4584_v13 }
 0x2ad   : > { %v1019_v37 = vpop.permute.xlu1 %1018 }
 0x2ae   : > { %4075 = vmatmul.mubr.msk.f32.vlgmr.msra.gmra.mrb[4].mxu0 %vm689_vm4, %v1019_v37  ;;  %v1370_v37 = vld [vmem:[%s5687_s4 + $0x18] sm:$0xff] }
 0x2af   : > { %4084 = vmatprep.mubr.msk.f32.mxu0 %vm4583_vm1, %v4584_v13 }
 0x2b1   : > { %v1187_v38 = vpop.permute.xlu1 %1186 }
 0x2b2   : > { %4083 = vmatpush3.xpose.msk.msra.mxu0 %vm689_vm4, %v1187_v38  ;;  %v4267_v38 = vpack.c.bf16 %v1370_v37, %v1369_v36  ;;  %v1681_v36 = vld [vmem:[%s5695_s12 + $0x30] sm:$0xff]  ;;  %v1682_v37 = vld [vmem:[%s5695_s12 + $0x38] sm:$0xff] }
 0x2b3   : > { %4263 = vmatprep.subr.bf16.mxu0 %v4582_v10 }
 0x2b5   : > { %v1185_v39 = vpop.permute.xlu1 %1184 }
 0x2b6   : > { %4085 = vmatmul.mubr.msk.f32.vlgmr.msra.gmra.mrb[6].mxu0 %vm689_vm4, %v1185_v39 }
 0x2b7   : > { %4100 = vmatprep.mubr.msk.f32.mxu0 %vm4583_vm1, %v4584_v13 }
 0x378   : > { %v760_v40 = vpop.f32.mrb[0].mxu1 }
 0x379   : > { %v764_v41 = vmul.f32 0.35355338, %v760_v40  ;;  %v4056_v42 = vpop.f32.mrb[1].mxu1 }
 0x37b   : > { %v765_v43 = vsel %vm689_vm4, %v764_v41, -inf }
 0x37c   : > { %766 = vmax.xlane.f32.xlu1 %v765_v43  ;;  %v926_v44 = vpop.f32.mrb[2].mxu0 }
 0x37d   : > { %v930_v45 = vmul.f32 0.35355338, %v926_v44  ;;  %v4066_v46 = vpop.f32.mrb[3].mxu0 }
 0x37f   : > { %v931_v47 = vsel %vm689_vm4, %v930_v45, -inf }
 0x380   : > { %932 = vmax.xlane.f32.xlu0 %v931_v47 }
 0x381   : > { %v1092_v48 = vpop.f32.mrb[4].mxu0 }
 0x382   : > { %v1096_v49 = vmul.f32 0.35355338, %v1092_v48  ;;  %v4076_v50 = vpop.f32.mrb[5].mxu0 }
 0x384   : > { %v1097_v51 = vsel %vm689_vm4, %v1096_v49, -inf }
 0x385   : > { %1098 = vmax.xlane.f32.xlu1 %v1097_v51  ;;  %v3652_v51 = vld [vmem:[%s5688_s5] ss:$0 sm:$0xff] }
 0x389   : > { %v1258_v52 = vpop.f32.mrb[6].mxu0 }
 0x38a   : > { %v1262_v53 = vmul.f32 0.35355338, %v1258_v52  ;;  %v4086_v54 = vpop.f32.mrb[7].mxu0 }
 0x38c   : > { %v1263_v55 = vsel %vm689_vm4, %v1262_v53, -inf }
 0x38d   : > { %1264 = vmax.xlane.f32.xlu0 %v1263_v55 }
 0x396   : > { %776 = vrot.lane.b32.xlu1 %v4740_v31, %s5706_s25  ;;  %s556_s25 = scalar_lea.vmem %s5716_s22, %s4697_s26  ;;  %s5723_s22 = smov 48  }
 0x409   : > { %v767_v56 = vpop.xlane.xlu1 %766 }
 0x40a   : > { %v768_v57 = vsub.f32 %v764_v41, %v767_v56 }
 0x40c   : > { %v769_v58 = vmul.f32 1.442695, %v768_v57 }
 0x40d   : > { %v933_v59 = vpop.xlane.xlu0 %932 }
 0x40e   : > { %4530 = vpow2.f32 %v769_v58  ;;  %v934_v60 = vsub.f32 %v930_v45, %v933_v59 }
 0x410   : > { %v935_v61 = vmul.f32 1.442695, %v934_v60 }
 0x412   : > { %4532 = vpow2.f32 %v935_v61  ;;  %v1099_v62 = vpop.xlane.xlu1 %1098 }
 0x413   : > { %v1100_v63 = vsub.f32 %v1096_v49, %v1099_v62  ;;  %v1493_v62 = vld [vmem:[%s5693_s10 + $0x28] sm:$0xff] }
 0x415   : > { %v1101_v0 = vmul.f32 1.442695, %v1100_v63  ;;  %v1488_v63 = vld [vmem:[%s5693_s10] sm:$0xff] }
 0x416   : > { %v777_v1 = vpop.permute.xlu1 %776 }
 0x417   : > { %4534 = vpow2.f32 %v1101_v0  ;;  %4058 = vmatpush3.msra.mxu1 %v777_v1  ;;  %v1492_v1 = vld [vmem:[%s5693_s10 + $0x20] sm:$0xff] }
 0x418   : > { %v4531_v2 = vpop.eup %4530  ;;  %4067 = vmatprep.subr.mxu1 %v4584_v13 }
 0x419   : > { %v771_v3 = vsel %vm689_vm4, %v4531_v2, 0.0 }
 0x41a   : > { %772 = vadd.xlane.f32.xlu1 %v771_v3  ;;  %v1265_v4 = vpop.xlane.xlu0 %1264  ;;  %v1501_v3 = vld [vmem:[%s5693_s10 + $0x68] sm:$0xff] }
 0x41b   : > { %v1266_v5 = vsub.f32 %v1262_v53, %v1265_v4  ;;  %v4271_v4 = vpack.c.bf16 %v1492_v1, %v1488_v63  ;;  %v3654_v63 = vld [vmem:[%s5691_s8] ss:$0 sm:$0xff]  ;;  %v1490_v1 = vld [vmem:[%s5693_s10 + $0x10] sm:$0xff] }
 0x41c   : > { %v4533_v6 = vpop.eup %4532 }
 0x41d   : > { %v1267_v7 = vmul.f32 1.442695, %v1266_v5  ;;  %v937_v8 = vsel %vm689_vm4, %v4533_v6, 0.0 }
 0x41e   : > { %938 = vadd.xlane.f32.xlu0 %v937_v8  ;;  %v1491_v8 = vld [vmem:[%s5693_s10 + $0x18] sm:$0xff] }
 0x41f   : > { %4536 = vpow2.f32 %v1267_v7  ;;  %v1500_v7 = vld [vmem:[%s5693_s10 + $0x60] sm:$0xff] }
 0x421   : > { %v4535_v9 = vpop.eup %4534 }
 0x422   : > { %v1103_v11 = vsel %vm689_vm4, %v4535_v9, 0.0 }
 0x423   : > { %1104 = vadd.xlane.f32.xlu1 %v1103_v11 }
 0x429   : > { %v4537_v12 = vpop.eup %4536 }
 0x42a   : > { %v1269_v14 = vsel %vm689_vm4, %v4537_v12, 0.0 }
 0x42b   : > { %1270 = vadd.xlane.f32.xlu0 %v1269_v14  ;;  %v1691_v14 = vld [vmem:[%s5695_s12 + $0x80] sm:$0xff] }
 0x434   : > { %1108 = vrot.lane.b32.xlu1 %v4740_v31, %s5703_s27  ;;  %s5725_s27 = smov 40  }
 0x438   : > { %1274 = vrot.lane.b32.xlu1 %v4740_v31, %s5701_s28  ;;  %s5708_s28 = smov 16  }
 0x441   : > { %942 = vrot.lane.b32.xlu0 %v4740_v31, %s5702_s29  ;;  %v1367_v31 = vld [vmem:[%s5687_s4] sm:$0xff]  ;;  %s5707_s29 = smov 24  }
 0x442   : > { %v4264_v33 = vpack.c.bf16 %v1368_v32, %v1367_v31  ;;  %v1680_v31 = vld [vmem:[%s5695_s12 + $0x28] sm:$0xff]  ;;  %v1697_v32 = vld [vmem:[%s5695_s12 + $0xb0] sm:$0xff] }
 0x444   : > { %4265 = vmatpush3.bf16.msra.mxu0 %v4264_v33  ;;  %v1698_v33 = vld [vmem:[%s5695_s12 + $0xb8] sm:$0xff] }
 0x445   : > { %4266 = vmatprep.subr.bf16.mxu0 %v4582_v10 }
 0x448   : > { %4268 = vmatpush3.bf16.msra.mxu0 %v4267_v38  ;;  %v1699_v38 = vld [vmem:[%s5695_s12 + $0xc0] sm:$0xff] }
 0x4a7   : > { %v773_v15 = vpop.xlane.xlu1 %772 }
 0x4a8   : > { %4538 = vrcp.f32 %v773_v15  ;;  %v1692_v15 = vld [vmem:[%s5695_s12 + $0x88] sm:$0xff] }
 0x4ab   : > { %v939_v16 = vpop.xlane.xlu0 %938 }
 0x4ac   : > { %4540 = vrcp.f32 %v939_v16  ;;  %v1675_v16 = vld [vmem:[%s5695_s12] sm:$0xff] }
 0x4b0   : > { %v1105_v17 = vpop.xlane.xlu1 %1104 }
 0x4b1   : > { %4542 = vrcp.f32 %v1105_v17  ;;  %v4285_v17 = vpack.c.bf16 %v1692_v15, %v1691_v14  ;;  %v1723_v14 = vld [vmem:[%s5695_s12 + $0x180] sm:$0xff]  ;;  %v1724_v15 = vld [vmem:[%s5695_s12 + $0x188] sm:$0xff] }
 0x4b2   : > { %v4539_v18 = vpop.eup %4538 }
 0x4b3   : > { %v775_v19 = vmul.f32 %v4539_v18, %v4531_v2  ;;  %v1497_v2 = vld [vmem:[%s5693_s10 + $0x48] sm:$0xff] }
 0x4b4   : > { %v1109_v23 = vpop.permute.xlu1 %1108  ;;  %v4273_v5 = vpack.c.bf16 %v1501_v3, %v1497_v2  ;;  %v1676_v18 = vld [vmem:[%s5695_s12 + $0x8] sm:$0xff]  ;;  %v1494_v2 = vld [vmem:[%s5693_s10 + $0x30] sm:$0xff] }
 0x4b5   : > { %4060 = vmatmul.mubr.msk.f32.vlgmr.msra.gmra.mrb[2].mxu1 %vm689_vm4, %v775_v19  ;;  %v1693_v19 = vld [vmem:[%s5695_s12 + $0x90] sm:$0xff] }
 0x4b6   : > { %4069 = vmatprep.mubr.msk.f32.mxu1 %vm4583_vm1, %v4584_v13  ;;  %v4541_v21 = vpop.eup %4540 }
 0x4b7   : > { %v941_v22 = vmul.f32 %v4541_v21, %v4533_v6  ;;  %v1496_v6 = vld [vmem:[%s5693_s10 + $0x40] sm:$0xff]  ;;  %v4287_v21 = vpack.c.bf16 %v1676_v18, %v1675_v16 }
 0x4b8   : > { %v1271_v20 = vpop.xlane.xlu0 %1270  ;;  %v1275_v27 = vpop.permute.xlu1 %1274  ;;  %v4275_v11 = vpack.c.bf16 %v1500_v7, %v1496_v6  ;;  %v4279_v7 = vpack.c.bf16 %v1494_v2, %v1490_v1  ;;  %v1707_v18 = vld [vmem:[%s5695_s12 + $0x100] sm:$0xff]  ;;  %v1720_v2 = vld [vmem:[%s5695_s12 + $0x168] sm:$0xff] }
 0x4b9   : > { %4544 = vrcp.f32 %v1271_v20  ;;  %v1694_v20 = vld [vmem:[%s5695_s12 + $0x98] sm:$0xff]  ;;  %v1719_v1 = vld [vmem:[%s5695_s12 + $0x160] sm:$0xff] }
 0x4bb   : > { %v4543_v25 = vpop.eup %4542 }
 0x4bc   : > { %v943_v24 = vpop.permute.xlu0 %942  ;;  %v1107_v26 = vmul.f32 %v4543_v25, %v4535_v9  ;;  %v1495_v9 = vld [vmem:[%s5693_s10 + $0x38] sm:$0xff]  ;;  %v1695_v25 = vld [vmem:[%s5695_s12 + $0xa0] sm:$0xff] }
 0x4bd   : > { %4068 = vmatpush3.msra.mxu1 %v943_v24  ;;  %v1678_v24 = vld [vmem:[%s5695_s12 + $0x18] sm:$0xff] }
 0x4be   : > { %4070 = vmatmul.mubr.msk.f32.vlgmr.msra.gmra.mrb[4].mxu1 %vm689_vm4, %v941_v22  ;;  %4077 = vmatprep.subr.mxu1 %v4584_v13  ;;  %v4289_v22 = vpack.c.bf16 %v1694_v20, %v1693_v19  ;;  %v1708_v19 = vld [vmem:[%s5695_s12 + $0x108] sm:$0xff]  ;;  %v1725_v20 = vld [vmem:[%s5695_s12 + $0x190] sm:$0xff] }
 0x4bf   : > { %4078 = vmatpush3.msra.mxu1 %v1109_v23  ;;  %4079 = vmatprep.mubr.msk.f32.mxu1 %vm4583_vm1, %v4584_v13  ;;  %v1677_v23 = vld [vmem:[%s5695_s12 + $0x10] sm:$0xff] }
 0x4c0   : > { %4087 = vmatprep.subr.mxu1 %v4584_v13 }
 0x4c2   : > { %4080 = vmatmul.mubr.msk.f32.vlgmr.msra.gmra.mrb[6].mxu1 %vm689_vm4, %v1107_v26  ;;  %v1696_v26 = vld [vmem:[%s5695_s12 + $0xa8] sm:$0xff] }
 0x4c3   : > { %v4545_v29 = vpop.eup %4544  ;;  %4088 = vmatpush3.msra.mxu1 %v1275_v27  ;;  %4089 = vmatprep.mubr.msk.f32.mxu1 %vm4583_vm1, %v4584_v13  ;;  %v4291_v27 = vpack.c.bf16 %v1678_v24, %v1677_v23  ;;  %v1709_v24 = vld [vmem:[%s5695_s12 + $0x110] sm:$0xff] }
 0x4c4   : > { %v1273_v30 = vmul.f32 %v4545_v29, %v4537_v12  ;;  %v4277_v12 = vpack.c.bf16 %v1495_v9, %v1491_v8  ;;  %4286 = vmatprep.subr.bf16.mxu1 %v4285_v17  ;;  %v4293_v29 = vpack.c.bf16 %v1696_v26, %v1695_v25  ;;  %v4317_v17 = vpack.c.bf16 %v1724_v15, %v1723_v14  ;;  %v1710_v25 = vld [vmem:[%s5695_s12 + $0x118] sm:$0xff]  ;;  %v1727_v26 = vld [vmem:[%s5695_s12 + $0x1a0] sm:$0xff] }
 0x4c5   : > { %v1504_v14 = vld [vmem:[%s5694_s11] sm:$0xf] }
 0x4c6   : > { %4090 = vmatmul.mubr.msk.f32.vlgmr.msra.gmra.mrb[8].mxu1 %vm689_vm4, %v1273_v30  ;;  %v1679_v30 = vld [vmem:[%s5695_s12 + $0x20] sm:$0xff] }
 0x4c7   : > { %4288 = vmatpush3.bf16.msra.mxu1 %v4287_v21  ;;  %v1726_v21 = vld [vmem:[%s5695_s12 + $0x198] sm:$0xff] }
 0x4c8   : > { %4290 = vmatprep.subr.bf16.mxu1 %v4289_v22  ;;  %v4319_v22 = vpack.c.bf16 %v1708_v19, %v1707_v18  ;;  %v4321_v23 = vpack.c.bf16 %v1726_v21, %v1725_v20 }
 0x4cb   : > { %4292 = vmatpush3.bf16.msra.mxu1 %v4291_v27  ;;  %v1728_v27 = vld [vmem:[%s5695_s12 + $0x1a8] sm:$0xff] }
 0x4cc   : > { %4294 = vmatprep.subr.bf16.mxu1 %v4293_v29  ;;  %v4323_v29 = vpack.c.bf16 %v1710_v25, %v1709_v24 }
 0x588   : > { %v848_v34 = vpop.f32.mrb[2].mxu1 }
 0x589   : > { %v4061_v35 = vpop.f32.mrb[3].mxu1 }
 0x58a   : > { %v4297_v35 = vpack.c.bf16 %v1698_v33, %v1697_v32  ;;  %v1712_v32 = vld [vmem:[%s5695_s12 + $0x128] sm:$0xff]  ;;  %v1729_v33 = vld [vmem:[%s5695_s12 + $0x1b0] sm:$0xff] }
 0x591   : > { %v1014_v39 = vpop.f32.mrb[4].mxu1 }
 0x592   : > { %1351 = vrot.lane.b32.xlu0 %v1014_v39, %s5709_s0  ;;  %v4071_v40 = vpop.f32.mrb[5].mxu1  ;;  %v1700_v39 = vld [vmem:[%s5695_s12 + $0xc8] sm:$0xff] }
 0x593   : > { %v4299_v40 = vpack.c.bf16 %v1682_v37, %v1681_v36  ;;  %v1713_v37 = vld [vmem:[%s5695_s12 + $0x130] sm:$0xff] }
 0x595   : > { %v1180_v41 = vpop.f32.mrb[6].mxu1 }
 0x596   : > { %1355 = vrot.lane.b32.xlu1 %v1180_v41, %s5708_s28  ;;  %v4081_v42 = vpop.f32.mrb[7].mxu1  ;;  %v4301_v41 = vpack.c.bf16 %v1700_v39, %v1699_v38  ;;  %v1714_v38 = vld [vmem:[%s5695_s12 + $0x138] sm:$0xff]  ;;  %v1731_v39 = vld [vmem:[%s5695_s12 + $0x1c0] sm:$0xff]  ;;  %s5717_s28 = smov 120  }
 0x597   : > { %v1683_v42 = vld [vmem:[%s5695_s12 + $0x40] sm:$0xff] }
 0x599   : > { %v1346_v43 = vpop.f32.mrb[8].mxu1 }
 0x59a   : > { %1359 = vrot.lane.b32.xlu0 %v1346_v43, %s5707_s29  ;;  %v4091_v44 = vpop.f32.mrb[9].mxu1  ;;  %v1684_v43 = vld [vmem:[%s5695_s12 + $0x48] sm:$0xff] }
 0x59b   : > { %v1701_v44 = vld [vmem:[%s5695_s12 + $0xd0] sm:$0xff] }
 0x604   : > { %v1352_v45 = vpop.permute.xlu0 %1351 }
 0x605   : > { %v1362_v47 = vsel %vm689_vm4, %v848_v34, %v1352_v45  ;;  %v4295_v34 = vpack.c.bf16 %v1680_v31, %v1679_v30  ;;  %v1702_v45 = vld [vmem:[%s5695_s12 + $0xd8] sm:$0xff]  ;;  %v4325_v30 = vpack.c.bf16 %v1728_v27, %v1727_v26  ;;  %v1711_v31 = vld [vmem:[%s5695_s12 + $0x120] sm:$0xff] }
 0x607   : > { %4296 = vmatpush3.bf16.msra.mxu1 %v4295_v34  ;;  %v1730_v34 = vld [vmem:[%s5695_s12 + $0x1b8] sm:$0xff] }
 0x608   : > { %v1356_v46 = vpop.permute.xlu1 %1355  ;;  %4298 = vmatprep.subr.bf16.mxu1 %v4297_v35  ;;  %v4327_v35 = vpack.c.bf16 %v1712_v32, %v1711_v31  ;;  %v4329_v36 = vpack.c.bf16 %v1730_v34, %v1729_v33  ;;  %v1893_v31 = vld [vmem:[%s5698_s15 + $0x10] sm:$0xff]  ;;  %v1894_v32 = vld [vmem:[%s5698_s15 + $0x18] sm:$0xff] }
 0x609   : > { %v1364_v48 = vsel %vm1363_vm5, %v1362_v47, %v1356_v46  ;;  %v4303_v46 = vpack.c.bf16 %v1684_v43, %v1683_v42  ;;  %v4305_v47 = vpack.c.bf16 %v1702_v45, %v1701_v44  ;;  %v1715_v43 = vld [vmem:[%s5695_s12 + $0x140] sm:$0xff]  ;;  %v1716_v44 = vld [vmem:[%s5695_s12 + $0x148] sm:$0xff] }
 0x60a   : > { %v4335_v45 = vpack.c.bf16 %v1716_v44, %v1715_v43  ;;  %v1897_v44 = vld [vmem:[%s5698_s15 + $0x30] sm:$0xff] }
 0x60b   : > { %4300 = vmatpush3.bf16.msra.mxu1 %v4299_v40  ;;  %v1732_v40 = vld [vmem:[%s5695_s12 + $0x1c8] sm:$0xff] }
 0x60c   : > { %v1360_v49 = vpop.permute.xlu0 %1359  ;;  %4302 = vmatprep.subr.bf16.mxu1 %v4301_v41  ;;  %v4331_v41 = vpack.c.bf16 %v1714_v38, %v1713_v37  ;;  %v4333_v42 = vpack.c.bf16 %v1732_v40, %v1731_v39  ;;  %v1895_v38 = vld [vmem:[%s5698_s15 + $0x20] sm:$0xff]  ;;  %v1896_v39 = vld [vmem:[%s5698_s15 + $0x28] sm:$0xff] }
 0x60d   : > { %v1366_v50 = vsel %vm1365_vm6, %v1364_v48, %v1360_v49  ;;  %v1685_v48 = vld [vmem:[%s5695_s12 + $0x50] sm:$0xff]  ;;  %v1686_v49 = vld [vmem:[%s5695_s12 + $0x58] sm:$0xff] }
 0x60e   : > { %4101 = vmatmul.mubr.msk.f32.vlgmr.msra.gmra.mrb[8].mxu0 %vm565_vm0, %v1366_v50  ;;  %v1703_v50 = vld [vmem:[%s5695_s12 + $0xe0] sm:$0xff] }
 0x60f   : > { %1593 = vmatprep.mubr.f32.mxu0 %v4584_v13  ;;  %4304 = vmatpush3.bf16.msra.mxu1 %v4303_v46  ;;  %v1687_v46 = vld [vmem:[%s5695_s12 + $0x60] sm:$0xff] }
 0x610   : > { %4306 = vmatprep.subr.bf16.mxu1 %v4305_v47  ;;  %v1688_v47 = vld [vmem:[%s5695_s12 + $0x68] sm:$0xff] }
 0x6e1   : > { %v1447_v52 = vpop.f32.mrb[8].mxu0 }
 0x6e2   : > { %v1448_v53 = vadd.f32 %v3652_v51, %v1447_v52  ;;  %v4102_v54 = vpop.f32.mrb[9].mxu0  ;;  %v1704_v51 = vld [vmem:[%s5695_s12 + $0xe8] sm:$0xff]  ;;  %v4307_v52 = vpack.c.bf16 %v1686_v49, %v1685_v48  ;;  %v4311_v48 = vpack.c.bf16 %v1688_v47, %v1687_v46  ;;  %v1733_v49 = vld [vmem:[%s5695_s12 + $0x1d0] sm:$0xff]  ;;  %v1899_v47 = vld [vmem:[%s5698_s15 + $0x40] sm:$0xff] }
 0x6e4   : > { %v4831_v55 = vadd.f32 %v1448_v53, %v4731_v28  ;;  %v1489_v28 = vld [vmem:[%s5693_s10 + $0x8] sm:$0xff]  ;;  %v4309_v53 = vpack.c.bf16 %v1704_v51, %v1703_v50  ;;  %4308 = vmatpush3.bf16.msra.mxu1 %v4307_v52  ;;  %v1734_v50 = vld [vmem:[%s5695_s12 + $0x1d8] sm:$0xff]  ;;  %v1705_v52 = vld [vmem:[%s5695_s12 + $0xf0] sm:$0xff] }
 0x6e5   : > { %v4269_v0 = vpack.c.bf16 %v1493_v62, %v1489_v28  ;;  %v4337_v51 = vpack.c.bf16 %v1734_v50, %v1733_v49  ;;  %v1901_v50 = vld [vmem:[%s5698_s15 + $0x50] sm:$0xff] }
 0x6e6   : > { %v1454_v56 = vsel %vm565_vm0, %v4831_v55, 0.0  ;;  %4310 = vmatprep.subr.bf16.mxu1 %v4309_v53  ;;  %v1706_v53 = vld [vmem:[%s5695_s12 + $0xf8] sm:$0xff] }
 0x6e7   : > { %1455 = vadd.xlane.f32.xlu1 %v1454_v56  ;;  %4270 = vmatprep.subr.bf16.mxu0 %v4269_v0 }
 0x6e8   : > { %4272 = vmatpush1.bf16.msra.mxu0 %v4271_v4  ;;  %v3655_v4 = vld [vmem:[%s5692_s9] ss:$0 sm:$0xff]  ;;  %4312 = vmatpush3.bf16.msra.mxu1 %v4311_v48  ;;  %v1900_v48 = vld [vmem:[%s5698_s15 + $0x48] sm:$0xff] }
 0x6e9   : > { %4274 = vmatprep.subr.bf16.mxu0 %v4273_v5  ;;  %v1499_v5 = vld [vmem:[%s5693_s10 + $0x58] sm:$0xff]  ;;  %v4362_v49 = vpack.c.bf16 %v1900_v48, %v1899_v47  ;;  %v3664_v47 = vld [vmem:[%s5690_s7 + $0x1] ss:$0 sm:$0xff] }
 0x6ec   : > { %4276 = vmatpush1.bf16.msra.mxu0 %v4275_v11  ;;  %v1498_v11 = vld [vmem:[%s5693_s10 + $0x50] sm:$0xff] }
 0x6ed   : > { %4278 = vmatprep.subr.bf16.mxu0 %v4277_v12  ;;  %v1502_v12 = vld [vmem:[%s5693_s10 + $0x70] sm:$0xff] }
 0x6ee   : > { %v4283_v16 = vpack.c.bf16 %v1502_v12, %v1498_v11 }
 0x774   : > { %v1456_v57 = vpop.xlane.xlu1 %1455 }
 0x775   : > { %v1457_v58 = vmul.f32 0.03125, %v1456_v57 }
 0x777   : > { %v4836_v59 = vsub.f32 %v4831_v55, %v1457_v58 }
 0x779   : > { %v1459_v60 = vmul.f32 %v4836_v59, %v4836_v59  ;;  %v1470_v0 = vmul.f32 %v3654_v63, %v4836_v59  ;;  %v1503_v59 = vld [vmem:[%s5693_s10 + $0x78] sm:$0xff]  ;;  %v1736_v63 = vld [vmem:[%s5695_s12 + $0x1e8] sm:$0xff] }
 0x77a   : > { %v4281_v9 = vpack.c.bf16 %v1503_v59, %v1499_v5  ;;  %v1738_v5 = vld [vmem:[%s5695_s12 + $0x1f8] sm:$0xff] }
 0x77b   : > { %v1460_v61 = vsel %vm565_vm0, %v1459_v60, 0.0 }
 0x77c   : > { %1461 = vadd.xlane.f32.xlu0 %v1460_v61 }
 0x809   : > { %v1462_v54 = vpop.xlane.xlu0 %1461 }
 0x80a   : > { %v1463_v56 = vmul.f32 0.032258064, %v1462_v54  ;;  %v1717_v54 = vld [vmem:[%s5695_s12 + $0x150] sm:$0xff] }
 0x80c   : > { %4546 = vrsqrt.f32 %v1463_v56  ;;  %vm1473_vm7 = vcmp.eq.f32.partialorder %v1463_v56, inf  ;;  %v1476_v60 = vand.u32 2147483648, %v1463_v56  ;;  %vm1475_vm8 = vcmp.eq.f32.partialorder %v1463_v56, 0.0 }
 0x816   : > { %v4547_v57 = vpop.eup %4546 }
 0x817   : > { %v1472_v58 = vmul.f32 %v4547_v57, %v1463_v56  ;;  %v1718_v57 = vld [vmem:[%s5695_s12 + $0x158] sm:$0xff] }
 0x819   : > { %v1474_v61 = vsel %vm1473_vm7, %v1463_v56, %v1472_v58  ;;  %v4313_v56 = vpack.c.bf16 %v1706_v53, %v1705_v52  ;;  %v1689_v58 = vld [vmem:[%s5695_s12 + $0x70] sm:$0xff]  ;;  %v1903_v53 = vld [vmem:[%s5698_s15 + $0x60] sm:$0xff] }
 0x81a   : > { %v1477_v28 = vsel %vm1475_vm8, %v1476_v60, %v1474_v61  ;;  %v1690_v60 = vld [vmem:[%s5695_s12 + $0x78] sm:$0xff]  ;;  %v4339_v61 = vpack.c.bf16 %v1718_v57, %v1717_v54  ;;  %v1904_v54 = vld [vmem:[%s5698_s15 + $0x68] sm:$0xff] }
 0x81b   : > { %v1478_v62 = vadd.f32 1e-06, %v1477_v28  ;;  %v4315_v28 = vpack.c.bf16 %v1690_v60, %v1689_v58  ;;  %4314 = vmatprep.subr.bf16.mxu1 %v4313_v56  ;;  %v1887_v56 = vld [vmem:[%s5697_s14] sm:$0xff]  ;;  %v4368_v57 = vpack.c.bf16 %v1904_v54, %v1903_v53  ;;  %v1888_v58 = vld [vmem:[%s5697_s14 + $0x8] sm:$0xff] }
 0x81c   : > { %v4374_v60 = vpack.c.bf16 %v1888_v58, %v1887_v56 }
 0x81d   : > { %4548 = vrcp.f32 %v1478_v62  ;;  %v1735_v62 = vld [vmem:[%s5695_s12 + $0x1e0] sm:$0xff]  ;;  %4316 = vmatpush3.bf16.msra.mxu1 %v4315_v28  ;;  %v1906_v28 = vld [vmem:[%s5698_s15 + $0x78] sm:$0xff] }
 0x81e   : > { %4349 = vmatprep.subr.bf16.mxu1 %v4582_v10 }
 0x827   : > { %v4549_v3 = vpop.eup %4548 }
 0x828   : > { %v1480_v6 = vmul.f32 %v4549_v3, %v1470_v0  ;;  %v4341_v0 = vpack.c.bf16 %v1736_v63, %v1735_v62  ;;  %v4343_v3 = vpack.c.bf16 %v1720_v2, %v1719_v1  ;;  %v1889_v62 = vld [vmem:[%s5697_s14 + $0x10] sm:$0xff]  ;;  %v562_v2 = vld [vmem:[%s556_s25] sm:$0xff]  ;;  %s5724_s25 = smov 56  }
 0x82a   : > { %v1487_v8 = vadd.f32 %v3655_v4, %v1480_v6  ;;  %v1737_v4 = vld [vmem:[%s5695_s12 + $0x1f0] sm:$0xff] }
 0x82b   : > { %v4345_v59 = vpack.c.bf16 %v1738_v5, %v1737_v4  ;;  %v1721_v6 = vld [vmem:[%s5695_s12 + $0x170] sm:$0xff] }
 0x82c   : > { %3656 = vmatmul.mubr.msk.f32.vlgmr.msra.gmra.mrb[10].mxu0 %vm565_vm0, %v1487_v8 }
 0x82d   : > { %4280 = vmatpush1.bf16.msra.mxu0 %v4279_v7  ;;  %1664 = vmatprep.mubr.f32.mxu0 %v4584_v13  ;;  %v1722_v7 = vld [vmem:[%s5695_s12 + $0x178] sm:$0xff] }
 0x82e   : > { %4282 = vmatprep.subr.bf16.mxu0 %v4281_v9  ;;  %v1506_v9 = vlaneseq }
 0x830   : > { %v5093_v11 = vshrl.u32 %v1506_v9, 7 }
 0x831   : > { %4284 = vmatpush1.bf16.msra.mxu0 %v4283_v16 }
 0x832   : > { %4318 = vmatprep.subr.bf16.mxu0 %v4317_v17  ;;  %v1508_v12 = vsub.s32 0, %v5093_v11  ;;  %v1512_v15 = vsub.s32 1, %v5093_v11  ;;  %v1516_v21 = vsub.s32 2, %v5093_v11  ;;  %v1520_v25 = vsub.s32 3, %v5093_v11 }
 0x834   : > { %3657 = vmatmul.mubr.msk.f32.vlgmr.msra.gmra.mrb[12].mxu0 %vm565_vm0, %v1487_v8  ;;  %v4347_v8 = vpack.c.bf16 %v1722_v7, %v1721_v6  ;;  %v1509_v16 = vrot.slane %v1504_v14, %v1508_v12  ;;  %v1513_v17 = vrot.slane %v1504_v14, %v1512_v15  ;;  %v1521_v33 = vrot.slane %v1504_v14, %v1520_v25 }
 0x835   : > { %4320 = vmatpush3.bf16.msra.mxu0 %v4319_v22  ;;  %v1891_v22 = vld [vmem:[%s5698_s15] sm:$0xff] }
 0x836   : > { %4322 = vmatprep.subr.bf16.mxu0 %v4321_v23  ;;  %v1892_v23 = vld [vmem:[%s5698_s15 + $0x8] sm:$0xff] }
 0x837   : > { %v4350_v27 = vpack.c.bf16 %v1892_v23, %v1891_v22 }
 0x839   : > { %4324 = vmatpush3.bf16.msra.mxu0 %v4323_v29 }
 0x83a   : > { %4326 = vmatprep.subr.bf16.mxu0 %v4325_v30  ;;  %v1517_v30 = vrot.slane %v1504_v14, %v1516_v21 }
 0x83d   : > { %4328 = vmatpush3.bf16.msra.mxu0 %v4327_v35  ;;  %v4353_v35 = vpack.c.bf16 %v1894_v32, %v1893_v31  ;;  %v3668_v31 = vld [vmem:[%s5685_s2 + $0x38] sm:$0xff] }
 0x83e   : > { %4330 = vmatprep.subr.bf16.mxu0 %v4329_v36 }
 0x841   : > { %4332 = vmatpush3.bf16.msra.mxu0 %v4331_v41 }
 0x842   : > { %4334 = vmatprep.subr.bf16.mxu0 %v4333_v42  ;;  %v4356_v42 = vpack.c.bf16 %v1896_v39, %v1895_v38 }
 0x845   : > { %4336 = vmatpush3.bf16.msra.mxu0 %v4335_v45  ;;  %v1898_v45 = vld [vmem:[%s5698_s15 + $0x38] sm:$0xff] }
 0x846   : > { %4338 = vmatprep.subr.bf16.mxu0 %v4337_v51  ;;  %v4359_v46 = vpack.c.bf16 %v1898_v45, %v1897_v44  ;;  %v1902_v51 = vld [vmem:[%s5698_s15 + $0x58] sm:$0xff]  ;;  %v3663_v44 = vld [vmem:[%s5689_s6 + $0x1] ss:$0 sm:$0xff] }
 0x847   : > { %v4365_v52 = vpack.c.bf16 %v1902_v51, %v1901_v50  ;;  %v3670_v50 = vld [vmem:[%s5686_s3 + $0x1] ss:$0 sm:$0xff] }
 0x849   : > { %4340 = vmatpush3.bf16.msra.mxu0 %v4339_v61  ;;  %v1905_v61 = vld [vmem:[%s5698_s15 + $0x70] sm:$0xff] }
 0x84a   : > { %4342 = vmatprep.subr.bf16.mxu0 %v4341_v0  ;;  %v4371_v63 = vpack.c.bf16 %v1906_v28, %v1905_v61  ;;  %v1890_v0 = vld [vmem:[%s5697_s14 + $0x18] sm:$0xff] }
 0x84b   : > { %v4377_v1 = vpack.c.bf16 %v1890_v0, %v1889_v62 }
 0x84d   : > { %4344 = vmatpush3.bf16.msra.mxu0 %v4343_v3 }
 0x84e   : > { %4346 = vmatprep.subr.bf16.mxu0 %v4345_v59  ;;  %v3658_v59 = vld [vmem:[%s5696_s13] ss:$0 sm:$0xff] }
 0x851   : > { %4348 = vmatpush3.bf16.msra.mxu0 %v4347_v8 }
 0x852   : > { %4373 = vmatprep.subr.bf16.mxu0 %v4582_v10 }
 0x8ff   : > { %v1595_v18 = vpop.f32.mrb[10].mxu0 }
 0x900   : > { %v1596_v19 = vadd.f32 %v1595_v18, %v1509_v16  ;;  %v1597_v20 = vpop.f32.mrb[11].mxu0 }
 0x901   : > { %v1598_v24 = vadd.f32 %v1597_v20, %v1513_v17 }
 0x902   : > { %v1671_v29 = vmax.f32 %v1596_v19, 0.0 }
 0x903   : > { %v1672_v26 = vmax.f32 %v1598_v24, 0.0 }
 0x905   : > { %1810 = vmatprep.mubr.f32.mxu1 %v1672_v26 }
 0x906   : > { %1811 = vmatmul.mubr.f32.vlgmr.msra.gmra.mrb[10].mxu1 %v1671_v29  ;;  %v3667_v29 = vld [vmem:[%s5685_s2 + $0x30] sm:$0xff] }
 0x907   : > { %v1666_v34 = vpop.f32.mrb[12].mxu0  ;;  %4351 = vmatpush3.bf16.msra.mxu1 %v4350_v27  ;;  %4135 = vmatprep.mubr.msk.f32.mxu1 %vm4583_vm1, %v4584_v13  ;;  %v3666_v27 = vld [vmem:[%s5685_s2 + $0x28] sm:$0xff]  ;;  %v4383_v32 = vpack.c.bf16 %v3668_v31, %v3667_v29 }
 0x908   : > { %v1667_v36 = vadd.f32 %v1666_v34, %v1517_v30  ;;  %v1668_v37 = vpop.f32.mrb[13].mxu0  ;;  %4352 = vmatprep.subr.bf16.mxu1 %v4582_v10 }
 0x909   : > { %v1669_v40 = vadd.f32 %v1668_v37, %v1521_v33 }
 0x90a   : > { %v1673_v43 = vmax.f32 %v1667_v36, 0.0 }
 0x90b   : > { %v1674_v41 = vmax.f32 %v1669_v40, 0.0  ;;  %4354 = vmatpush3.bf16.msra.mxu1 %v4353_v35 }
 0x90c   : > { %4355 = vmatprep.subr.bf16.mxu1 %v4582_v10 }
 0x90d   : > { %1880 = vmatprep.mubr.f32.mxu0 %v1674_v41 }
 0x90e   : > { %1881 = vmatmul.mubr.f32.vlgmr.msra.gmra.mrb[14].mxu0 %v1673_v43 }
 0x90f   : > { %4357 = vmatpush3.bf16.msra.mxu1 %v4356_v42  ;;  %4146 = vmatprep.mubr.msk.f32.mxu0 %vm4583_vm1, %v4584_v13 }
 0x910   : > { %4358 = vmatprep.subr.bf16.mxu1 %v4582_v10  ;;  %4375 = vmatpush3.bf16.msra.mxu0 %v4374_v60 }
 0x911   : > { %4376 = vmatprep.subr.bf16.mxu0 %v4582_v10 }
 0x913   : > { %4360 = vmatpush3.bf16.msra.mxu1 %v4359_v46 }
 0x914   : > { %4361 = vmatprep.subr.bf16.mxu1 %v4582_v10  ;;  %4378 = vmatpush3.bf16.msra.mxu0 %v4377_v1 }
 0x915   : > { %4379 = vmatprep.subr.bf16.mxu0 %v4582_v10 }
 0x917   : > { %4363 = vmatpush3.bf16.msra.mxu1 %v4362_v49 }
 0x918   : > { %4364 = vmatprep.subr.bf16.mxu1 %v4582_v10 }
 0x91b   : > { %4366 = vmatpush3.bf16.msra.mxu1 %v4365_v52 }
 0x91c   : > { %4367 = vmatprep.subr.bf16.mxu1 %v4582_v10 }
 0x91f   : > { %4369 = vmatpush3.bf16.msra.mxu1 %v4368_v57 }
 0x920   : > { %4370 = vmatprep.subr.bf16.mxu1 %v4582_v10 }
 0x923   : > { %4372 = vmatpush3.bf16.msra.mxu1 %v4371_v63 }
 0x924   : > { %4175 = vmatprep.subr.mxu1 %v4584_v13 }
 0x926   : > { %4136 = vmatmul.mubr.f32.vlgmr.msra.gmra.mrb[12].mxu1 %v562_v2 }
 0x927   : > { %4177 = vmatprep.mubr.msk.f32.mxu1 %vm4583_vm1, %v4584_v13 }
 0x9d9   : > { %v3863_v3 = vpop.f32.mrb[10].mxu1 }
 0x9da   : > { %v3864_v4 = vpop.f32.mrb[11].mxu1 }
 0x9db   : > { %v3865_v5 = vadd.f32 %v3864_v4, %v3863_v3 }
 0x9dd   : > { %v1813_v8 = vadd.f32 %v3865_v5, %v3658_v59 }
 0x9e1   : > { %v3898_v6 = vpop.f32.mrb[14].mxu0 }
 0x9e2   : > { %v3899_v7 = vpop.f32.mrb[15].mxu0 }
 0x9e3   : > { %v3900_v9 = vadd.f32 %v3899_v7, %v3898_v6 }
 0x9e5   : > { %v1883_v14 = vadd.f32 %v3900_v9, %v1813_v8 }
 0x9e7   : > { %v1886_v16 = vadd.f32 %v1883_v14, %v4831_v55  ;;  %v3665_v55 = vld [vmem:[%s5685_s2 + $0x20] sm:$0xff] }
 0x9e8   : > { %v4380_v30 = vpack.c.bf16 %v3666_v27, %v3665_v55 }
 0x9e9   : > { %4147 = vmatmul.mubr.msk.f32.vlgmr.msra.gmra.mrb[16].mxu0 %vm565_vm0, %v1886_v16  ;;  %v2062_v17 = vsel %vm565_vm0, %v1886_v16, 0.0 }
 0x9ea   : > { %2063 = vadd.xlane.f32.xlu0 %v2062_v17  ;;  %4157 = vmatprep.mubr.msk.f32.mxu0 %vm4583_vm1, %v4584_v13 }
 0x9eb   : > { %4381 = vmatpush3.bf16.msra.mxu0 %v4380_v30 }
 0x9ec   : > { %4382 = vmatprep.subr.bf16.mxu0 %v4582_v10 }
 0x9ef   : > { %4384 = vmatpush3.bf16.msra.mxu0 %v4383_v32 }
 0x9f0   : > { %4160 = vmatprep.subr.mxu0 %v4584_v13 }
 0x9f9   : > { %v1973_v18 = vpop.f32.mrb[12].mxu1 }
 0x9fa   : > { %v4137_v19 = vpop.f32.mrb[13].mxu1 }
 0xa77   : > { %v2064_v20 = vpop.xlane.xlu0 %2063 }
 0xa78   : > { %v2065_v22 = vmul.f32 0.03125, %v2064_v20 }
 0xa7a   : > { %v2066_v23 = vsub.f32 %v1886_v16, %v2065_v22 }
 0xa7c   : > { %v2067_v24 = vmul.f32 %v2066_v23, %v2066_v23  ;;  %v2078_v45 = vmul.f32 %v3663_v44, %v2066_v23 }
 0xa7e   : > { %v2068_v26 = vsel %vm565_vm0, %v2067_v24, 0.0 }
 0xa7f   : > { %2069 = vadd.xlane.f32.xlu1 %v2068_v26 }
 0xabc   : > { %v2046_v33 = vpop.f32.mrb[16].mxu0 }
 0xabd   : > { %v5213_v34 = vadd.f32 %v2046_v33, %v1973_v18  ;;  %v4148_v35 = vpop.f32.mrb[17].mxu0 }
 0xb0c   : > { %v2070_v36 = vpop.xlane.xlu1 %2069 }
 0xb0d   : > { %v2071_v37 = vmul.f32 0.032258064, %v2070_v36 }
 0xb0f   : > { %4550 = vrsqrt.f32 %v2071_v37  ;;  %vm2081_vm9 = vcmp.eq.f32.partialorder %v2071_v37, inf  ;;  %v2084_v40 = vand.u32 2147483648, %v2071_v37  ;;  %vm2083_vm10 = vcmp.eq.f32.partialorder %v2071_v37, 0.0 }
 0xb19   : > { %v4551_v38 = vpop.eup %4550 }
 0xb1a   : > { %v2080_v39 = vmul.f32 %v4551_v38, %v2071_v37 }
 0xb1c   : > { %v2082_v41 = vsel %vm2081_vm9, %v2071_v37, %v2080_v39 }
 0xb1d   : > { %v2085_v42 = vsel %vm2083_vm10, %v2084_v40, %v2082_v41 }
 0xb1e   : > { %v2086_v43 = vadd.f32 1e-06, %v2085_v42 }
 0xb20   : > { %4552 = vrcp.f32 %v2086_v43 }
 0xb2a   : > { %v4553_v46 = vpop.eup %4552 }
 0xb2b   : > { %v2088_v48 = vmul.f32 %v4553_v46, %v2078_v45 }
 0xb2d   : > { %v5221_v49 = vadd.f32 %v3664_v47, %v2088_v48 }
 0xb2f   : > { %4158 = vmatmul.mubr.msk.f32.vlgmr.msra.gmra.mrb[18].mxu0 %vm565_vm0, %v5221_v49 }
 0xb30   : > { %4162 = vmatprep.mubr.msk.f32.mxu0 %vm4583_vm1, %v4584_v13 }
 0xc02   : > { %v2178_v51 = vpop.f32.mrb[18].mxu0 }
 0xc03   : > { %v5230_v52 = vadd.f32 %v3670_v50, %v2178_v51  ;;  %v4159_v53 = vpop.f32.mrb[19].mxu0 }
 0xc05   : > { %2183 = vrot.lane.b32.xlu0 %v5230_v52, %s4586_s19  ;;  %s5720_s19 = smov 64  }
 0xc09   : > { %2349 = vrot.lane.b32.xlu0 %v5230_v52, %s4587_s1  ;;  %s5721_s1 = smov 80  }
 0xc0d   : > { %2347 = vrot.lane.b32.xlu0 %v5230_v52, %s5717_s28 }
 0xc11   : > { %2513 = vrot.lane.b32.xlu0 %v5230_v52, %s5718_s21 }
 0xc15   : > { %2679 = vrot.lane.b32.xlu0 %v5230_v52, %s5719_s23  ;;  %s560_s23 = scalar_lea.vmem %s5700_s17, %s4697_s26 }
 0xc77   : > { %v2184_v54 = vpop.permute.xlu0 %2183 }
 0xc78   : > { %4161 = vmatpush3.xpose.msk.msra.mxu0 %vm689_vm4, %v2184_v54 }
 0xc79   : > { %4165 = vmatprep.subr.mxu0 %v4584_v13 }
 0xc7b   : > { %4163 = vmatmul.mubr.msk.f32.vlgmr.msra.gmra.mrb[20].mxu0 %vm689_vm4, %v5230_v52  ;;  %v2350_v4 = vpop.permute.xlu0 %2349 }
 0xc7c   : > { %4167 = vmatprep.mubr.msk.f32.mxu0 %vm4583_vm1, %v4584_v13 }
 0xc7f   : > { %v2348_v6 = vpop.permute.xlu0 %2347 }
 0xc83   : > { %v2514_v7 = vpop.permute.xlu0 %2513 }
 0xc87   : > { %v2680_v9 = vpop.permute.xlu0 %2679 }
 0xd4e   : > { %v2255_v56 = vpop.f32.mrb[20].mxu0 }
 0xd4f   : > { %v2259_v57 = vmul.f32 0.35355338, %v2255_v56  ;;  %v4164_v58 = vpop.f32.mrb[21].mxu0 }
 0xd51   : > { %v2260_v60 = vsel %vm689_vm4, %v2259_v57, -inf }
 0xd52   : > { %2261 = vmax.xlane.f32.xlu1 %v2260_v60 }
 0xd63   : > { %2271 = vrot.lane.b32.xlu1 %v5230_v52, %s5720_s19 }
 0xd67   : > { %2515 = vrot.lane.b32.xlu1 %v5230_v52, %s5721_s1  ;;  %s5726_s1 = smov 8  }
 0xddf   : > { %v2262_v61 = vpop.xlane.xlu1 %2261 }
 0xde0   : > { %v2263_v28 = vsub.f32 %v2259_v57, %v2262_v61 }
 0xde2   : > { %v2264_v62 = vmul.f32 1.442695, %v2263_v28  ;;  %v3684_v28 = vld [vmem:[%s5687_s4 + $0x20] sm:$0xff] }
 0xde3   : > { %v2272_v63 = vpop.permute.xlu1 %2271 }
 0xde4   : > { %4554 = vpow2.f32 %v2264_v62  ;;  %4166 = vmatpush3.msra.mxu0 %v2272_v63  ;;  %v3685_v62 = vld [vmem:[%s5687_s4 + $0x28] sm:$0xff]  ;;  %v3686_v63 = vld [vmem:[%s5687_s4 + $0x30] sm:$0xff] }
 0xde5   : > { %4170 = vmatprep.subr.mxu0 %v4584_v13 }
 0xde7   : > { %v2516_v2 = vpop.permute.xlu1 %2515 }
 0xdee   : > { %v4555_v0 = vpop.eup %4554 }
 0xdef   : > { %v2266_v1 = vsel %vm689_vm4, %v4555_v0, 0.0 }
 0xdf0   : > { %2267 = vadd.xlane.f32.xlu1 %v2266_v1  ;;  %v3687_v1 = vld [vmem:[%s5687_s4 + $0x38] sm:$0xff] }
 0xe01   : > { %2681 = vrot.lane.b32.xlu1 %v5230_v52, %s5722_s18  ;;  %s5727_s18 = smov 16  }
 0xe7d   : > { %v2268_v3 = vpop.xlane.xlu1 %2267 }
 0xe7e   : > { %4556 = vrcp.f32 %v2268_v3 }
 0xe81   : > { %v2682_v8 = vpop.permute.xlu1 %2681 }
 0xe88   : > { %v4557_v5 = vpop.eup %4556 }
 0xe89   : > { %v2270_v59 = vmul.f32 %v4557_v5, %v4555_v0  ;;  %v4386_v0 = vpack.c.bf16 %v3685_v62, %v3684_v28  ;;  %v3762_v28 = vld [vmem:[%s5695_s12 + $0x380] sm:$0xff]  ;;  %v3763_v62 = vld [vmem:[%s5695_s12 + $0x388] sm:$0xff] }
 0xe8b   : > { %4168 = vmatmul.mubr.msk.f32.vlgmr.msra.gmra.mrb[22].mxu0 %vm689_vm4, %v2270_v59 }
 0xe8c   : > { %4171 = vmatpush3.xpose.msk.msra.mxu0 %vm689_vm4, %v2350_v4  ;;  %4172 = vmatprep.mubr.msk.f32.mxu0 %vm4583_vm1, %v4584_v13 }
 0xe8d   : > { %4180 = vmatprep.subr.mxu0 %v4584_v13 }
 0xe8f   : > { %4173 = vmatmul.mubr.msk.f32.vlgmr.msra.gmra.mrb[24].mxu0 %vm689_vm4, %v2348_v6 }
 0xe90   : > { %4181 = vmatpush3.xpose.msk.msra.mxu0 %vm689_vm4, %v2516_v2  ;;  %4182 = vmatprep.mubr.msk.f32.mxu0 %vm4583_vm1, %v4584_v13  ;;  %v4389_v2 = vpack.c.bf16 %v3687_v1, %v3686_v63  ;;  %v4439_v63 = vpack.c.bf16 %v3763_v62, %v3762_v28  ;;  %v3752_v28 = vld [vmem:[%s5695_s12 + $0x330] sm:$0xff]  ;;  %v3753_v62 = vld [vmem:[%s5695_s12 + $0x338] sm:$0xff] }
 0xe91   : > { %4190 = vmatprep.subr.mxu0 %v4584_v13 }
 0xe93   : > { %4183 = vmatmul.mubr.msk.f32.vlgmr.msra.gmra.mrb[26].mxu0 %vm689_vm4, %v2514_v7 }
 0xe94   : > { %4191 = vmatpush3.xpose.msk.msra.mxu0 %vm689_vm4, %v2682_v8  ;;  %4192 = vmatprep.mubr.msk.f32.mxu0 %vm4583_vm1, %v4584_v13 }
 0xe95   : > { %4385 = vmatprep.subr.bf16.mxu0 %v4582_v10 }
 0xe97   : > { %4193 = vmatmul.mubr.msk.f32.vlgmr.msra.gmra.mrb[28].mxu0 %vm689_vm4, %v2680_v9 }
 0xe98   : > { %4208 = vmatprep.mubr.msk.f32.mxu0 %vm4583_vm1, %v4584_v13  ;;  %4387 = vmatpush3.bf16.msra.mxu0 %v4386_v0 }
 0xe99   : > { %4388 = vmatprep.subr.bf16.mxu0 %v4582_v10 }
 0xe9c   : > { %4390 = vmatpush3.bf16.msra.mxu0 %v4389_v2 }
 0xf5e   : > { %v5275_v14 = vpop.f32.mrb[22].mxu0 }
 0xf5f   : > { %v4169_v16 = vpop.f32.mrb[23].mxu0 }
 0xf62   : > { %v2421_v17 = vpop.f32.mrb[24].mxu0 }
 0xf63   : > { %v2425_v18 = vmul.f32 0.35355338, %v2421_v17  ;;  %v4174_v19 = vpop.f32.mrb[25].mxu0 }
 0xf65   : > { %v2426_v20 = vsel %vm689_vm4, %v2425_v18, -inf }
 0xf66   : > { %2427 = vmax.xlane.f32.xlu1 %v2426_v20  ;;  %v2587_v22 = vpop.f32.mrb[26].mxu0  ;;  %v3689_v20 = vld [vmem:[%s5688_s5 + $0x1] ss:$0 sm:$0xff] }
 0xf67   : > { %v2591_v23 = vmul.f32 0.35355338, %v2587_v22  ;;  %v4184_v24 = vpop.f32.mrb[27].mxu0 }
 0xf69   : > { %v2592_v26 = vsel %vm689_vm4, %v2591_v23, -inf }
 0xf6a   : > { %2593 = vmax.xlane.f32.xlu0 %v2592_v26  ;;  %v2753_v55 = vpop.f32.mrb[28].mxu0 }
 0xf6b   : > { %v2757_v27 = vmul.f32 0.35355338, %v2753_v55  ;;  %v4194_v29 = vpop.f32.mrb[29].mxu0 }
 0xf6d   : > { %v2758_v30 = vsel %vm689_vm4, %v2757_v27, -inf }
 0xf6e   : > { %2759 = vmax.xlane.f32.xlu0 %v2758_v30 }
 0xff3   : > { %v2428_v31 = vpop.xlane.xlu1 %2427 }
 0xff4   : > { %v2429_v32 = vsub.f32 %v2425_v18, %v2428_v31 }
 0xff6   : > { %v2430_v33 = vmul.f32 1.442695, %v2429_v32  ;;  %v3696_v32 = vld [vmem:[%s5693_s10 + $0x88] sm:$0xff] }
 0xff7   : > { %v2594_v35 = vpop.xlane.xlu0 %2593 }
 0xff8   : > { %4558 = vpow2.f32 %v2430_v33  ;;  %v2595_v36 = vsub.f32 %v2591_v23, %v2594_v35  ;;  %v3698_v33 = vld [vmem:[%s5693_s10 + $0x98] sm:$0xff] }
 0xffa   : > { %v2596_v37 = vmul.f32 1.442695, %v2595_v36  ;;  %v3702_v36 = vld [vmem:[%s5693_s10 + $0xb8] sm:$0xff] }
 0xffb   : > { %v2760_v42 = vpop.xlane.xlu0 %2759 }
 0xffc   : > { %4560 = vpow2.f32 %v2596_v37  ;;  %v2761_v43 = vsub.f32 %v2757_v27, %v2760_v42  ;;  %v3695_v37 = vld [vmem:[%s5693_s10 + $0x80] sm:$0xff]  ;;  %v3701_v42 = vld [vmem:[%s5693_s10 + $0xb0] sm:$0xff] }
 0xffe   : > { %v2762_v44 = vmul.f32 1.442695, %v2761_v43  ;;  %v3704_v43 = vld [vmem:[%s5693_s10 + $0xc8] sm:$0xff] }
0x1000   : > { %4562 = vpow2.f32 %v2762_v44 }
0x1002   : > { %v4559_v38 = vpop.eup %4558 }
0x1003   : > { %v2432_v39 = vsel %vm689_vm4, %v4559_v38, 0.0 }
0x1004   : > { %2433 = vadd.xlane.f32.xlu1 %v2432_v39  ;;  %v4399_v39 = vpack.c.bf16 %v3702_v36, %v3698_v33  ;;  %v3749_v36 = vld [vmem:[%s5695_s12 + $0x318] sm:$0xff] }
0x1006   : > { %v4561_v40 = vpop.eup %4560  ;;  %4400 = vmatprep.subr.bf16.mxu0 %v4399_v39  ;;  %v3766_v39 = vld [vmem:[%s5695_s12 + $0x3a0] sm:$0xff] }
0x1007   : > { %v2598_v41 = vsel %vm689_vm4, %v4561_v40, 0.0 }
0x1008   : > { %2599 = vadd.xlane.f32.xlu0 %v2598_v41  ;;  %v3697_v41 = vld [vmem:[%s5693_s10 + $0x90] sm:$0xff] }
0x1009   : > { %v4401_v44 = vpack.c.bf16 %v3701_v42, %v3697_v41 }
0x100a   : > { %v4563_v45 = vpop.eup %4562 }
0x100b   : > { %v2764_v46 = vsel %vm689_vm4, %v4563_v45, 0.0 }
0x1015   : > { %2603 = vrot.lane.b32.xlu1 %v5230_v52, %s5723_s22  ;;  %s5728_s22 = smov 24  }
0x101e   : > { %2437 = vrot.lane.b32.xlu0 %v5230_v52, %s5724_s25 }
0x1039   : > { %2765 = vadd.xlane.f32.xlu1 %v2764_v46  ;;  %v3706_v46 = vld [vmem:[%s5693_s10 + $0xd8] sm:$0xff] }
0x104a   : > { %2769 = vrot.lane.b32.xlu1 %v5230_v52, %s5725_s27 }
0x1091   : > { %v2434_v47 = vpop.xlane.xlu1 %2433 }
0x1092   : > { %4564 = vrcp.f32 %v2434_v47  ;;  %v3710_v47 = vld [vmem:[%s5693_s10 + $0xf8] sm:$0xff] }
0x1095   : > { %v2600_v48 = vpop.xlane.xlu0 %2599  ;;  %v2604_v54 = vpop.permute.xlu1 %2603 }
0x1096   : > { %4566 = vrcp.f32 %v2600_v48 }
0x1099   : > { %v2438_v50 = vpop.permute.xlu0 %2437 }
0x109a   : > { %4176 = vmatpush3.msra.mxu1 %v2438_v50  ;;  %v4403_v50 = vpack.c.bf16 %v3710_v47, %v3706_v46  ;;  %v3750_v47 = vld [vmem:[%s5695_s12 + $0x320] sm:$0xff] }
0x109b   : > { %4185 = vmatprep.subr.mxu1 %v4584_v13 }
0x109c   : > { %v4565_v51 = vpop.eup %4564 }
0x109d   : > { %v2436_v53 = vmul.f32 %v4565_v51, %v4559_v38  ;;  %v3699_v38 = vld [vmem:[%s5693_s10 + $0xa0] sm:$0xff] }
0x109e   : > { %v3703_v51 = vld [vmem:[%s5693_s10 + $0xc0] sm:$0xff] }
0x109f   : > { %4178 = vmatmul.mubr.msk.f32.vlgmr.msra.gmra.mrb[14].mxu1 %vm689_vm4, %v2436_v53  ;;  %v3707_v53 = vld [vmem:[%s5693_s10 + $0xe0] sm:$0xff] }
0x10a0   : > { %v4567_v56 = vpop.eup %4566  ;;  %4186 = vmatpush3.msra.mxu1 %v2604_v54  ;;  %4187 = vmatprep.mubr.msk.f32.mxu1 %vm4583_vm1, %v4584_v13  ;;  %v3705_v54 = vld [vmem:[%s5693_s10 + $0xd0] sm:$0xff] }
0x10a1   : > { %v2602_v57 = vmul.f32 %v4567_v56, %v4561_v40  ;;  %4195 = vmatprep.subr.mxu1 %v4584_v13  ;;  %v4393_v40 = vpack.c.bf16 %v3699_v38, %v3695_v37  ;;  %v4397_v56 = vpack.c.bf16 %v3707_v53, %v3703_v51  ;;  %v3734_v37 = vld [vmem:[%s5695_s12 + $0x2a0] sm:$0xff]  ;;  %v3735_v38 = vld [vmem:[%s5695_s12 + $0x2a8] sm:$0xff]  ;;  %v3737_v51 = vld [vmem:[%s5695_s12 + $0x2b8] sm:$0xff] }
0x10a2   : > { %v3768_v53 = vld [vmem:[%s5695_s12 + $0x3b0] sm:$0xff] }
0x10a3   : > { %4188 = vmatmul.mubr.msk.f32.vlgmr.msra.gmra.mrb[16].mxu1 %vm689_vm4, %v2602_v57  ;;  %v3709_v57 = vld [vmem:[%s5693_s10 + $0xf0] sm:$0xff] }
0x10a4   : > { %4197 = vmatprep.mubr.msk.f32.mxu1 %vm4583_vm1, %v4584_v13 }
0x10c6   : > { %v2766_v52 = vpop.xlane.xlu1 %2765 }
0x10c7   : > { %4568 = vrcp.f32 %v2766_v52  ;;  %v4405_v52 = vpack.c.bf16 %v3709_v57, %v3705_v54  ;;  %v3769_v54 = vld [vmem:[%s5695_s12 + $0x3b8] sm:$0xff] }
0x10ca   : > { %v2770_v58 = vpop.permute.xlu1 %2769 }
0x10cb   : > { %4196 = vmatpush3.msra.mxu1 %v2770_v58  ;;  %v3730_v58 = vld [vmem:[%s5695_s12 + $0x280] sm:$0xff] }
0x10d1   : > { %v4569_v60 = vpop.eup %4568 }
0x10d2   : > { %v2768_v61 = vmul.f32 %v4569_v60, %v4563_v45  ;;  %v3708_v45 = vld [vmem:[%s5693_s10 + $0xe8] sm:$0xff] }
0x10d3   : > { %v4395_v48 = vpack.c.bf16 %v3708_v45, %v3704_v43  ;;  %v3731_v60 = vld [vmem:[%s5695_s12 + $0x288] sm:$0xff]  ;;  %v3718_v43 = vld [vmem:[%s5695_s12 + $0x220] sm:$0xff]  ;;  %v4415_v45 = vpack.c.bf16 %v3735_v38, %v3734_v37 }
0x10d4   : > { %4198 = vmatmul.mubr.msk.f32.vlgmr.msra.gmra.mrb[18].mxu1 %vm689_vm4, %v2768_v61  ;;  %v4407_v61 = vpack.c.bf16 %v3731_v60, %v3730_v58  ;;  %v3721_v58 = vld [vmem:[%s5695_s12 + $0x238] sm:$0xff]  ;;  %v3726_v37 = vld [vmem:[%s5695_s12 + $0x260] sm:$0xff]  ;;  %v3727_v38 = vld [vmem:[%s5695_s12 + $0x268] sm:$0xff] }
0x10d5   : > { %3092 = vmatprep.mubr.f32.mxu1 %v4584_v13 }
0x1172   : > { %v2509_v3 = vpop.f32.mrb[14].mxu1 }
0x1173   : > { %2846 = vrot.lane.b32.xlu0 %v2509_v3, %s5726_s1  ;;  %v4179_v4 = vpop.f32.mrb[15].mxu1 }
0x1176   : > { %v2675_v5 = vpop.f32.mrb[16].mxu1 }
0x1177   : > { %2850 = vrot.lane.b32.xlu1 %v2675_v5, %s5727_s18  ;;  %v4189_v59 = vpop.f32.mrb[17].mxu1 }
0x11a7   : > { %v2841_v6 = vpop.f32.mrb[18].mxu1 }
0x11a8   : > { %2854 = vrot.lane.b32.xlu0 %v2841_v6, %s5728_s22  ;;  %v4199_v7 = vpop.f32.mrb[19].mxu1 }
0x11a9   : > { %v3693_v7 = vld [vmem:[%s5691_s8 + $0x1] ss:$0 sm:$0xff] }
0x11e5   : > { %v2847_v8 = vpop.permute.xlu0 %2846 }
0x11e6   : > { %v2857_v16 = vsel %vm689_vm4, %v5275_v14, %v2847_v8  ;;  %v3694_v8 = vld [vmem:[%s5692_s9 + $0x1] ss:$0 sm:$0xff] }
0x11e9   : > { %v2851_v9 = vpop.permute.xlu1 %2850 }
0x11ea   : > { %v2858_v17 = vsel %vm1363_vm5, %v2857_v16, %v2851_v9  ;;  %v3714_v9 = vld [vmem:[%s5695_s12 + $0x200] sm:$0xff]  ;;  %v3715_v16 = vld [vmem:[%s5695_s12 + $0x208] sm:$0xff] }
0x121a   : > { %v2855_v18 = vpop.permute.xlu0 %2854 }
0x121b   : > { %v2859_v19 = vsel %vm1365_vm6, %v2858_v17, %v2855_v18  ;;  %v3746_v18 = vld [vmem:[%s5695_s12 + $0x300] sm:$0xff] }
0x121c   : > { %4209 = vmatmul.mubr.msk.f32.vlgmr.msra.gmra.mrb[30].mxu0 %vm565_vm0, %v2859_v19  ;;  %v3747_v19 = vld [vmem:[%s5695_s12 + $0x308] sm:$0xff] }
0x121d   : > { %3163 = vmatprep.mubr.f32.mxu0 %v4584_v13  ;;  %4402 = vmatpush1.bf16.msra.mxu0 %v4401_v44  ;;  %v3719_v44 = vld [vmem:[%s5695_s12 + $0x228] sm:$0xff] }
0x121e   : > { %4404 = vmatprep.subr.bf16.mxu0 %v4403_v50  ;;  %v3736_v50 = vld [vmem:[%s5695_s12 + $0x2b0] sm:$0xff] }
0x121f   : > { %v4419_v60 = vpack.c.bf16 %v3737_v51, %v3736_v50  ;;  %v3776_v50 = vld [vmem:[%s5695_s12 + $0x3f0] sm:$0xff] }
0x1221   : > { %4406 = vmatpush1.bf16.msra.mxu0 %v4405_v52  ;;  %v3720_v52 = vld [vmem:[%s5695_s12 + $0x230] sm:$0xff] }
0x1222   : > { %4440 = vmatprep.subr.bf16.mxu0 %v4439_v63  ;;  %v3738_v63 = vld [vmem:[%s5695_s12 + $0x2c0] sm:$0xff] }
0x12ef   : > { %v2942_v22 = vpop.f32.mrb[30].mxu0 }
0x12f0   : > { %v2943_v23 = vadd.f32 %v3689_v20, %v2942_v22  ;;  %v4210_v24 = vpop.f32.mrb[31].mxu0  ;;  %v3732_v20 = vld [vmem:[%s5695_s12 + $0x290] sm:$0xff] }
0x12f1   : > { %v3764_v24 = vld [vmem:[%s5695_s12 + $0x390] sm:$0xff] }
0x12f2   : > { %v5325_v26 = vadd.f32 %v2943_v23, %v5221_v49  ;;  %v3700_v49 = vld [vmem:[%s5693_s10 + $0xa8] sm:$0xff]  ;;  %v3733_v23 = vld [vmem:[%s5695_s12 + $0x298] sm:$0xff] }
0x12f3   : > { %v4391_v35 = vpack.c.bf16 %v3700_v49, %v3696_v32  ;;  %v4411_v49 = vpack.c.bf16 %v3733_v23, %v3732_v20  ;;  %v3724_v23 = vld [vmem:[%s5695_s12 + $0x250] sm:$0xff] }
0x12f4   : > { %v2951_v14 = vsel %vm565_vm0, %v5325_v26, 0.0 }
0x12f5   : > { %2952 = vadd.xlane.f32.xlu1 %v2951_v14  ;;  %4392 = vmatprep.subr.bf16.mxu1 %v4391_v35  ;;  %v3765_v14 = vld [vmem:[%s5695_s12 + $0x398] sm:$0xff]  ;;  %v3748_v35 = vld [vmem:[%s5695_s12 + $0x310] sm:$0xff] }
0x12f6   : > { %4394 = vmatpush1.bf16.msra.mxu1 %v4393_v40  ;;  %v4443_v33 = vpack.c.bf16 %v3765_v14, %v3764_v24  ;;  %v3767_v40 = vld [vmem:[%s5695_s12 + $0x3a8] sm:$0xff]  ;;  %v4445_v42 = vpack.c.bf16 %v3749_v36, %v3748_v35  ;;  %v3725_v24 = vld [vmem:[%s5695_s12 + $0x258] sm:$0xff] }
0x12f7   : > { %4396 = vmatprep.subr.bf16.mxu1 %v4395_v48  ;;  %v4447_v46 = vpack.c.bf16 %v3767_v40, %v3766_v39  ;;  %v3751_v48 = vld [vmem:[%s5695_s12 + $0x328] sm:$0xff]  ;;  %v4433_v40 = vpack.c.bf16 %v3727_v38, %v3726_v37  ;;  %v3780_v38 = vld [vmem:[%s5697_s14 + $0x20] sm:$0xff] }
0x12f8   : > { %v4449_v57 = vpack.c.bf16 %v3751_v48, %v3750_v47  ;;  %v3728_v47 = vld [vmem:[%s5695_s12 + $0x270] sm:$0xff]  ;;  %v3729_v48 = vld [vmem:[%s5695_s12 + $0x278] sm:$0xff] }
0x12f9   : > { %v4437_v51 = vpack.c.bf16 %v3729_v48, %v3728_v47 }
0x12fa   : > { %4398 = vmatpush1.bf16.msra.mxu1 %v4397_v56  ;;  %v4417_v56 = vpack.c.bf16 %v3719_v44, %v3718_v43  ;;  %v3744_v44 = vld [vmem:[%s5695_s12 + $0x2f0] sm:$0xff] }
0x12fb   : > { %4408 = vmatprep.subr.bf16.mxu1 %v4407_v61  ;;  %v4451_v61 = vpack.c.bf16 %v3769_v54, %v3768_v53  ;;  %v3777_v53 = vld [vmem:[%s5695_s12 + $0x3f8] sm:$0xff]  ;;  %v3760_v54 = vld [vmem:[%s5695_s12 + $0x370] sm:$0xff] }
0x1382   : > { %v2953_v55 = vpop.xlane.xlu1 %2952 }
0x1383   : > { %v2954_v27 = vmul.f32 0.03125, %v2953_v55 }
0x1385   : > { %v2955_v29 = vsub.f32 %v5325_v26, %v2954_v27  ;;  %v4409_v27 = vpack.c.bf16 %v3715_v16, %v3714_v9  ;;  %v3755_v9 = vld [vmem:[%s5695_s12 + $0x348] sm:$0xff]  ;;  %v3740_v16 = vld [vmem:[%s5695_s12 + $0x2d0] sm:$0xff] }
0x1387   : > { %v2956_v30 = vmul.f32 %v2955_v29, %v2955_v29  ;;  %v2967_v17 = vmul.f32 %v3693_v7, %v2955_v29  ;;  %v4441_v29 = vpack.c.bf16 %v3747_v19, %v3746_v18  ;;  %v3772_v18 = vld [vmem:[%s5695_s12 + $0x3d0] sm:$0xff]  ;;  %v3773_v19 = vld [vmem:[%s5695_s12 + $0x3d8] sm:$0xff] }
0x1389   : > { %v2957_v31 = vsel %vm565_vm0, %v2956_v30, 0.0  ;;  %v3716_v30 = vld [vmem:[%s5695_s12 + $0x210] sm:$0xff] }
0x138a   : > { %2958 = vadd.xlane.f32.xlu0 %v2957_v31  ;;  %v3717_v31 = vld [vmem:[%s5695_s12 + $0x218] sm:$0xff] }
0x138b   : > { %v4413_v41 = vpack.c.bf16 %v3717_v31, %v3716_v30  ;;  %v3742_v30 = vld [vmem:[%s5695_s12 + $0x2e0] sm:$0xff]  ;;  %v3743_v31 = vld [vmem:[%s5695_s12 + $0x2e8] sm:$0xff] }
0x138c   : > { %v4431_v36 = vpack.c.bf16 %v3743_v31, %v3742_v30  ;;  %v3796_v30 = vld [vmem:[%s5698_s15 + $0xe0] sm:$0xff]  ;;  %v3797_v31 = vld [vmem:[%s5698_s15 + $0xe8] sm:$0xff] }
0x1417   : > { %v2959_v0 = vpop.xlane.xlu0 %2958 }
0x1418   : > { %v2960_v1 = vmul.f32 0.032258064, %v2959_v0  ;;  %v3739_v0 = vld [vmem:[%s5695_s12 + $0x2c8] sm:$0xff] }
0x141a   : > { %4570 = vrsqrt.f32 %v2960_v1  ;;  %vm2970_vm11 = vcmp.eq.f32.partialorder %v2960_v1, inf  ;;  %v2973_v4 = vand.u32 2147483648, %v2960_v1  ;;  %vm2972_vm12 = vcmp.eq.f32.partialorder %v2960_v1, 0.0 }
0x1424   : > { %v4571_v2 = vpop.eup %4570 }
0x1425   : > { %v2969_v3 = vmul.f32 %v4571_v2, %v2960_v1  ;;  %v3771_v2 = vld [vmem:[%s5695_s12 + $0x3c8] sm:$0xff] }
0x1427   : > { %v2971_v5 = vsel %vm2970_vm11, %v2960_v1, %v2969_v3  ;;  %v3770_v1 = vld [vmem:[%s5695_s12 + $0x3c0] sm:$0xff]  ;;  %v4421_v3 = vpack.c.bf16 %v3721_v58, %v3720_v52 }
0x1428   : > { %v2974_v59 = vsel %vm2972_vm12, %v2973_v4, %v2971_v5  ;;  %v4453_v4 = vpack.c.bf16 %v3753_v62, %v3752_v28  ;;  %v3722_v5 = vld [vmem:[%s5695_s12 + $0x240] sm:$0xff]  ;;  %v4455_v7 = vpack.c.bf16 %v3771_v2, %v3770_v1 }
0x1429   : > { %v2975_v6 = vadd.f32 1e-06, %v2974_v59  ;;  %v3723_v59 = vld [vmem:[%s5695_s12 + $0x248] sm:$0xff]  ;;  %v3711_v58 = vld [vmem:[%s5694_s11 + $0x4] sm:$0xf] }
0x142a   : > { %v4425_v20 = vpack.c.bf16 %v3723_v59, %v3722_v5  ;;  %v3012_v28 = vrot.slane %v3711_v58, %v1512_v15  ;;  %v3020_v62 = vrot.slane %v3711_v58, %v1520_v25  ;;  %v3784_v5 = vld [vmem:[%s5698_s15 + $0x80] sm:$0xff] }
0x142b   : > { %4572 = vrcp.f32 %v2975_v6  ;;  %v4423_v6 = vpack.c.bf16 %v3739_v0, %v3738_v63 }
0x1435   : > { %v4573_v22 = vpop.eup %4572 }
0x1436   : > { %v2977_v55 = vmul.f32 %v4573_v22, %v2967_v17  ;;  %v3741_v17 = vld [vmem:[%s5695_s12 + $0x2d8] sm:$0xff] }
0x1437   : > { %v4427_v14 = vpack.c.bf16 %v3741_v17, %v3740_v16  ;;  %v3788_v17 = vld [vmem:[%s5698_s15 + $0xa0] sm:$0xff] }
0x1438   : > { %v2984_v32 = vadd.f32 %v3694_v8, %v2977_v55  ;;  %v3754_v8 = vld [vmem:[%s5695_s12 + $0x340] sm:$0xff]  ;;  %v4459_v55 = vpack.c.bf16 %v3773_v19, %v3772_v18  ;;  %v3789_v18 = vld [vmem:[%s5698_s15 + $0xa8] sm:$0xff] }
0x1439   : > { %v4457_v22 = vpack.c.bf16 %v3755_v9, %v3754_v8  ;;  %v3786_v8 = vld [vmem:[%s5698_s15 + $0x90] sm:$0xff]  ;;  %v3787_v9 = vld [vmem:[%s5698_s15 + $0x98] sm:$0xff]  ;;  %v4478_v19 = vpack.c.bf16 %v3789_v18, %v3788_v17 }
0x143a   : > { %3712 = vmatmul.mubr.msk.f32.vlgmr.msra.gmra.mrb[20].mxu1 %vm565_vm0, %v2984_v32  ;;  %3713 = vmatmul.mubr.msk.f32.vlgmr.msra.gmra.mrb[32].mxu0 %vm565_vm0, %v2984_v32  ;;  %v3774_v32 = vld [vmem:[%s5695_s12 + $0x3e0] sm:$0xff]  ;;  %v4475_v16 = vpack.c.bf16 %v3787_v9, %v3786_v8 }
0x143b   : > { %4410 = vmatpush3.bf16.msra.mxu1 %v4409_v27  ;;  %4442 = vmatpush3.bf16.msra.mxu0 %v4441_v29  ;;  %v3756_v27 = vld [vmem:[%s5695_s12 + $0x350] sm:$0xff]  ;;  %v3757_v29 = vld [vmem:[%s5695_s12 + $0x358] sm:$0xff] }
0x143c   : > { %4412 = vmatprep.subr.bf16.mxu1 %v4411_v49  ;;  %4444 = vmatprep.subr.bf16.mxu0 %v4443_v33  ;;  %v3775_v49 = vld [vmem:[%s5695_s12 + $0x3e8] sm:$0xff]  ;;  %v4429_v33 = vpack.c.bf16 %v3725_v24, %v3724_v23  ;;  %v4461_v35 = vpack.c.bf16 %v3757_v29, %v3756_v27  ;;  %v3795_v27 = vld [vmem:[%s5698_s15 + $0xd8] sm:$0xff] }
0x143d   : > { %v4463_v39 = vpack.c.bf16 %v3775_v49, %v3774_v32  ;;  %v3793_v24 = vld [vmem:[%s5698_s15 + $0xc8] sm:$0xff]  ;;  %v4490_v32 = vpack.c.bf16 %v3797_v31, %v3796_v30  ;;  %v3798_v49 = vld [vmem:[%s5698_s15 + $0xf0] sm:$0xff] }
0x143f   : > { %4414 = vmatpush3.bf16.msra.mxu1 %v4413_v41  ;;  %4446 = vmatpush3.bf16.msra.mxu0 %v4445_v42  ;;  %v3758_v41 = vld [vmem:[%s5695_s12 + $0x360] sm:$0xff]  ;;  %v3759_v42 = vld [vmem:[%s5695_s12 + $0x368] sm:$0xff] }
0x1440   : > { %4416 = vmatprep.subr.bf16.mxu1 %v4415_v45  ;;  %4448 = vmatprep.subr.bf16.mxu0 %v4447_v46  ;;  %v4465_v43 = vpack.c.bf16 %v3759_v42, %v3758_v41  ;;  %v3745_v45 = vld [vmem:[%s5695_s12 + $0x2f8] sm:$0xff]  ;;  %v3782_v41 = vld [vmem:[%s5697_s14 + $0x30] sm:$0xff] }
0x1441   : > { %v4435_v46 = vpack.c.bf16 %v3745_v45, %v3744_v44  ;;  %v3779_v45 = vld [vmem:[%s5696_s13 + $0x1] ss:$0 sm:$0xff] }
0x1443   : > { %4418 = vmatpush3.bf16.msra.mxu1 %v4417_v56  ;;  %4450 = vmatpush3.bf16.msra.mxu0 %v4449_v57  ;;  %v3761_v56 = vld [vmem:[%s5695_s12 + $0x378] sm:$0xff]  ;;  %v4467_v57 = vpack.c.bf16 %v3777_v53, %v3776_v50 }
0x1444   : > { %4420 = vmatprep.subr.bf16.mxu1 %v4419_v60  ;;  %4452 = vmatprep.subr.bf16.mxu0 %v4451_v61  ;;  %v4469_v52 = vpack.c.bf16 %v3761_v56, %v3760_v54  ;;  %v3008_v60 = vrot.slane %v3711_v58, %v1508_v12  ;;  %v3016_v61 = vrot.slane %v3711_v58, %v1516_v21  ;;  %v3785_v12 = vld [vmem:[%s5698_s15 + $0x88] sm:$0xff] }
0x1445   : > { %v4472_v11 = vpack.c.bf16 %v3785_v12, %v3784_v5 }
0x1447   : > { %4422 = vmatpush3.bf16.msra.mxu1 %v4421_v3  ;;  %4454 = vmatpush3.bf16.msra.mxu0 %v4453_v4 }
0x1448   : > { %4424 = vmatprep.subr.bf16.mxu1 %v4423_v6  ;;  %4456 = vmatprep.subr.bf16.mxu0 %v4455_v7 }
0x144b   : > { %4426 = vmatpush3.bf16.msra.mxu1 %v4425_v20  ;;  %4458 = vmatpush3.bf16.msra.mxu0 %v4457_v22  ;;  %v3790_v20 = vld [vmem:[%s5698_s15 + $0xb0] sm:$0xff]  ;;  %v3791_v22 = vld [vmem:[%s5698_s15 + $0xb8] sm:$0xff] }
0x144c   : > { %4428 = vmatprep.subr.bf16.mxu1 %v4427_v14  ;;  %4460 = vmatprep.subr.bf16.mxu0 %v4459_v55  ;;  %v4481_v23 = vpack.c.bf16 %v3791_v22, %v3790_v20  ;;  %v3794_v55 = vld [vmem:[%s5698_s15 + $0xd0] sm:$0xff] }
0x144d   : > { %v4487_v29 = vpack.c.bf16 %v3795_v27, %v3794_v55 }
0x144f   : > { %4430 = vmatpush3.bf16.msra.mxu1 %v4429_v33  ;;  %4462 = vmatpush3.bf16.msra.mxu0 %v4461_v35  ;;  %v3799_v33 = vld [vmem:[%s5698_s15 + $0xf8] sm:$0xff] }
0x1450   : > { %4432 = vmatprep.subr.bf16.mxu1 %v4431_v36  ;;  %4464 = vmatprep.subr.bf16.mxu0 %v4463_v39  ;;  %v4493_v35 = vpack.c.bf16 %v3799_v33, %v3798_v49  ;;  %v3660_v36 = vld [vmem:[%s5699_s16] ss:$0 sm:$0xff]  ;;  %v3781_v39 = vld [vmem:[%s5697_s14 + $0x28] sm:$0xff] }
0x1451   : > { %v2057_v37 = vadd.f32 %v3660_v36, %v5213_v34  ;;  %v3783_v34 = vld [vmem:[%s5697_s14 + $0x38] sm:$0xff] }
0x1452   : > { %v4499_v42 = vpack.c.bf16 %v3783_v34, %v3782_v41 }
0x1453   : > { %4434 = vmatpush3.bf16.msra.mxu1 %v4433_v40  ;;  %4466 = vmatpush3.bf16.msra.mxu0 %v4465_v43  ;;  %v4496_v40 = vpack.c.bf16 %v3781_v39, %v3780_v38 }
0x1454   : > { %4436 = vmatprep.subr.bf16.mxu1 %v4435_v46  ;;  %4468 = vmatprep.subr.bf16.mxu0 %v4467_v57 }
0x1457   : > { %4438 = vmatpush3.bf16.msra.mxu1 %v4437_v51  ;;  %4470 = vmatpush3.bf16.msra.mxu0 %v4469_v52  ;;  %v3802_v52 = vld [vmem:[%s5699_s16 + $0x1] ss:$0 sm:$0xff] }
0x1458   : > { %4471 = vmatprep.subr.bf16.mxu1 %v4582_v10  ;;  %4495 = vmatprep.subr.bf16.mxu0 %v4582_v10 }
0x150d   : > { %v3094_v63 = vpop.f32.mrb[20].mxu1  ;;  %v3165_v0 = vpop.f32.mrb[32].mxu0 }
0x150e   : > { %v3095_v1 = vadd.f32 %v3094_v63, %v3008_v60  ;;  %v3166_v2 = vadd.f32 %v3165_v0, %v3016_v61  ;;  %v3096_v3 = vpop.f32.mrb[21].mxu1  ;;  %v3167_v4 = vpop.f32.mrb[33].mxu0 }
0x150f   : > { %v3097_v21 = vadd.f32 %v3096_v3, %v3012_v28  ;;  %v3168_v59 = vadd.f32 %v3167_v4, %v3020_v62 }
0x1510   : > { %v3170_v25 = vmax.f32 %v3095_v1, 0.0  ;;  %v3172_v7 = vmax.f32 %v3166_v2, 0.0 }
0x1511   : > { %v3171_v15 = vmax.f32 %v3097_v21, 0.0  ;;  %v3173_v6 = vmax.f32 %v3168_v59, 0.0 }
0x1513   : > { %3311 = vmatprep.mubr.f32.mxu1 %v3171_v15  ;;  %3381 = vmatprep.mubr.f32.mxu0 %v3173_v6 }
0x1514   : > { %3312 = vmatmul.mubr.f32.vlgmr.msra.gmra.mrb[22].mxu1 %v3170_v25  ;;  %3382 = vmatmul.mubr.f32.vlgmr.msra.gmra.mrb[34].mxu0 %v3172_v7 }
0x1515   : > { %4473 = vmatpush3.bf16.msra.mxu1 %v4472_v11  ;;  %4243 = vmatprep.mubr.msk.f32.mxu1 %vm4583_vm1, %v4584_v13 }
0x1516   : > { %4474 = vmatprep.subr.bf16.mxu1 %v4582_v10  ;;  %4254 = vmatprep.mubr.msk.f32.mxu0 %vm4583_vm1, %v4584_v13  ;;  %v3792_v13 = vld [vmem:[%s5698_s15 + $0xc0] sm:$0xff] }
0x1517   : > { %v4484_v14 = vpack.c.bf16 %v3793_v24, %v3792_v13  ;;  %4497 = vmatpush3.bf16.msra.mxu0 %v4496_v40 }
0x1518   : > { %4498 = vmatprep.subr.bf16.mxu0 %v4582_v10 }
0x1519   : > { %4476 = vmatpush3.bf16.msra.mxu1 %v4475_v16 }
0x151a   : > { %4477 = vmatprep.subr.bf16.mxu1 %v4582_v10 }
0x151b   : > { %4500 = vmatpush3.bf16.msra.mxu0 %v4499_v42 }
0x151d   : > { %4479 = vmatpush3.bf16.msra.mxu1 %v4478_v19 }
0x151e   : > { %4480 = vmatprep.subr.bf16.mxu1 %v4582_v10 }
0x1521   : > { %4482 = vmatpush3.bf16.msra.mxu1 %v4481_v23 }
0x1522   : > { %4483 = vmatprep.subr.bf16.mxu1 %v4582_v10 }
0x1525   : > { %4485 = vmatpush3.bf16.msra.mxu1 %v4484_v14 }
0x1526   : > { %4486 = vmatprep.subr.bf16.mxu1 %v4582_v10 }
0x1529   : > { %4488 = vmatpush3.bf16.msra.mxu1 %v4487_v29 }
0x152a   : > { %4489 = vmatprep.subr.bf16.mxu1 %v4582_v10 }
0x152d   : > { %4491 = vmatpush3.bf16.msra.mxu1 %v4490_v32 }
0x152e   : > { %4492 = vmatprep.subr.bf16.mxu1 %v4582_v10 }
0x1531   : > { %4494 = vmatpush3.bf16.msra.mxu1 %v4493_v35 }
0x1534   : > { %4244 = vmatmul.mubr.f32.vlgmr.msra.gmra.mrb[24].mxu1 %v2057_v37 }
0x15e7   : > { %v3981_v43 = vpop.f32.mrb[22].mxu1  ;;  %v4016_v44 = vpop.f32.mrb[34].mxu0 }
0x15e8   : > { %v3982_v46 = vpop.f32.mrb[23].mxu1  ;;  %v4017_v47 = vpop.f32.mrb[35].mxu0 }
0x15e9   : > { %v3983_v10 = vadd.f32 %v3982_v46, %v3981_v43  ;;  %v4018_v48 = vadd.f32 %v4017_v47, %v4016_v44 }
0x15eb   : > { %v3314_v50 = vadd.f32 %v3983_v10, %v3779_v45 }
0x15ed   : > { %v3384_v51 = vadd.f32 %v4018_v48, %v3314_v50 }
0x15ef   : > { %v3387_v53 = vadd.f32 %v3384_v51, %v5325_v26 }
0x15f1   : > { %4255 = vmatmul.mubr.msk.f32.vlgmr.msra.gmra.mrb[36].mxu0 %vm565_vm0, %v3387_v53 }
0x1607   : > { %v3476_v54 = vpop.f32.mrb[24].mxu1 }
0x1608   : > { %v4245_v56 = vpop.f32.mrb[25].mxu1 }
0x16c4   : > { %v3549_v57 = vpop.f32.mrb[36].mxu0 }
0x16c5   : > { %v3550_v58 = vadd.f32 %v3549_v57, %v3476_v54  ;;  %v4256_v60 = vpop.f32.mrb[37].mxu0 }
0x16c7   : > { %v3561_v61 = vadd.f32 %v3802_v52, %v3550_v58 }
0x16c9   : > { %3562 = vst [vmem:[%s560_s23] sm:$0xff] %v3561_v61 }
0x16ca PF: > { %s27_s24 = sadd.s32 1, %s4580_s24  }
0x16cb   : > { %p24_p4 = scmp.ge.s32.totalorder %s27_s24, 4  }
0x16cd   :  { %26 = sbr.rel (!%p24_p4) target bundleno = 3 (0x3), region = 136 }

</bundles_post_ra>
